<compile_context>
chip_gen: v7x
topology: tpu7x:2x2x1
jax: 0.10.0
libtpu: 0.0.40
codegen_flags: <defaults>
</compile_context>

<pallas_src>
import functools

import jax
import jax.numpy as jnp
import numpy as np
from jax.experimental import pallas as pl
from jax.experimental.pallas import tpu as pltpu

NUM_PAR = 2  # leading "parallel" grid axis: 2-TC split on v7x, serial elsewhere


def _pixel_pair_kl_kernel(fs_ref, ft_ref, pr_ref, mask_ref, out_ref, *,
                          temperature, n_rows):
    i = pl.program_id(1)

    @pl.when(i == 0)
    def _init():
        out_ref[...] = jnp.zeros_like(out_ref)

    eps = jnp.float32(1e-12)
    fs4 = fs_ref[...].astype(jnp.float32)        # (4, TN, C) window taps
    ft4 = ft_ref[...].astype(jnp.float32)
    pr = pr_ref[...].astype(jnp.float32)         # (Mpad, C) padded prototypes
    valid = mask_ref[...] > 0.0                  # (1, Mpad) selection mask

    # AvgPool2d(kernel=2, stride=2) == mean over the 4 window taps (VPU adds).
    fs = (fs4[0] + fs4[1] + fs4[2] + fs4[3]) * jnp.float32(0.25)   # (TN, C)
    ft = (ft4[0] + ft4[1] + ft4[2] + ft4[3]) * jnp.float32(0.25)

    # F.normalize(p=2, dim=channel): x * rsqrt(max(sum x^2, eps^2)) == x / max(||x||, eps)
    fs = fs * jax.lax.rsqrt(jnp.maximum(jnp.sum(fs * fs, -1, keepdims=True), eps * eps))
    ft = ft * jax.lax.rsqrt(jnp.maximum(jnp.sum(ft * ft, -1, keepdims=True), eps * eps))

    inv_t = jnp.float32(1.0 / temperature)
    neg_big = jnp.float32(-1e30)
    dn = (((1,), (1,)), ((), ()))                # contract channel dims -> (TN, Mpad)
    s_sim = jax.lax.dot_general(fs, pr, dn, preferred_element_type=jnp.float32) * inv_t
    t_sim = jax.lax.dot_general(ft, pr, dn, preferred_element_type=jnp.float32) * inv_t
    s_sim = jnp.where(valid, s_sim, neg_big)     # padded / unselected prototypes out
    t_sim = jnp.where(valid, t_sim, neg_big)

    # Student: log_softmax over the prototype axis.
    s_shift = s_sim - jnp.max(s_sim, axis=-1, keepdims=True)
    log_p_s = s_shift - jnp.log(jnp.sum(jnp.exp(s_shift), axis=-1, keepdims=True))

    # Teacher: softmax + log_softmax; single exp, EUP reciprocal for the divide.
    t_shift = t_sim - jnp.max(t_sim, axis=-1, keepdims=True)
    e_t = jnp.exp(t_shift)
    t_sum = jnp.sum(e_t, axis=-1, keepdims=True)
    p_t = e_t * pl.reciprocal(t_sum, approx=True)
    log_p_t = t_shift - jnp.log(t_sum)

    # F.kl_div(log_p_s, p_t, 'batchmean') = sum(p_t * (log p_t - log p_s)) / N
    kl = jnp.where(valid, p_t * (log_p_t - log_p_s), jnp.float32(0.0))
    out_ref[...] = out_ref[...] + jnp.sum(kl)

    @pl.when(i == pl.num_programs(1) - 1)
    def _finalize():
        out_ref[...] = out_ref[...] * jnp.float32(1.0 / n_rows)


@functools.partial(jax.jit, static_argnames=("kmean_num", "temperature"))
def criterion_pixel_pair_g(feat_S, feat_T, proto_mem, proto_mask, kmean_num,
                           temperature=0.1):
    B, C, H, W = feat_S.shape
    # TODO(synk): ceil_mode AvgPool tail windows for odd H/W are not handled (even dims assumed).
    assert H % 2 == 0 and W % 2 == 0, "even spatial dims assumed"
    H2, W2 = H // 2, W // 2
    N = B * H2 * W2
    in_dtype = jnp.bfloat16   # halve HBM traffic of the bandwidth-bound kernel

    def windows(x):
        # NCHW -> (4, N, C), window-tap axis leading so sublanes stay dense.
        # TODO(synk): producing NHWC upstream would remove this extra HBM pass.
        x = jnp.transpose(x, (0, 2, 3, 1)).reshape(B, H2, 2, W2, 2, C)
        x = jnp.transpose(x, (2, 4, 0, 1, 3, 5)).reshape(4, N, C)
        return x.astype(in_dtype)

    fs_w = windows(feat_S)
    ft_w = windows(feat_T)

    # Tile over N: leading parallel axis of NUM_PAR, trailing arbitrary axis.
    tn_max = max(256, min(1024, (256 * 1024) // max(C, 1)))   # shrink tile as C grows
    per_core = pl.cdiv(N, NUM_PAR)
    TN = min(tn_max, max(8, ((per_core + 7) // 8) * 8))
    blocks_per_core = pl.cdiv(per_core, TN)
    Npad = NUM_PAR * blocks_per_core * TN
    if Npad != N:
        # Zero rows normalize to 0 -> identical student/teacher logits -> KL contribution 0.
        pad = Npad - N
        fs_w = jnp.pad(fs_w, ((0, 0), (0, pad), (0, 0)))
        ft_w = jnp.pad(ft_w, ((0, 0), (0, pad), (0, 0)))

    # Prototypes: pass them all, zero-padded to lane-dense Mpad, plus a validity
    # mask.  No host-side masked_select -> no host sync, no per-mask recompile.
    if kmean_num > 0:
        proto_flat = proto_mem.reshape(-1, proto_mem.shape[-1])
    else:
        proto_flat = proto_mem
    M_total = proto_flat.shape[0]
    Mpad = ((M_total + 127) // 128) * 128
    proto_pad = jnp.zeros((Mpad, C), jnp.float32).at[:M_total].set(
        proto_flat.astype(jnp.float32))
    mask_pad = jnp.zeros((1, Mpad), jnp.float32).at[0, :M_total].set(
        proto_mask.reshape(-1).astype(jnp.float32))

    kernel = functools.partial(_pixel_pair_kl_kernel,
                               temperature=float(temperature), n_rows=N)
    itemsize = jnp.dtype(in_dtype).itemsize
    cost = pl.CostEstimate(
        flops=4 * Npad * C * Mpad + 16 * Npad * C,
        transcendentals=2 * Npad * Mpad + 4 * Npad,
        bytes_accessed=2 * 4 * Npad * C * itemsize + Mpad * C * 4 + Mpad * 4 + NUM_PAR * 4,
    )

    out = pl.pallas_call(
        kernel,
        out_shape=jax.ShapeDtypeStruct((NUM_PAR, 1, 1), jnp.float32),
        grid=(NUM_PAR, blocks_per_core),
        in_specs=[
            pl.BlockSpec((4, TN, C), lambda p, i: (0, p * blocks_per_core + i, 0)),
            pl.BlockSpec((4, TN, C), lambda p, i: (0, p * blocks_per_core + i, 0)),
            pl.BlockSpec((Mpad, C), lambda p, i: (0, 0)),
            pl.BlockSpec((1, Mpad), lambda p, i: (0, 0)),
        ],
        out_specs=pl.BlockSpec((1, 1, 1), lambda p, i: (p, 0, 0)),
        compiler_params=pltpu.CompilerParams(
            dimension_semantics=("parallel", "arbitrary"),
            vmem_limit_bytes=48 * 1024 * 1024,
        ),
        cost_estimate=cost,
    )(fs_w, ft_w, proto_pad, mask_pad)
    # Each per-core partial is already divided by the true N; sum the partials.
    return jnp.sum(out)


def _reference(feat_S, feat_T, proto_mem, proto_mask, kmean_num, temperature=0.1):
    # Plain-JAX (f32) reference mirroring the PyTorch forward.
    B, C, H, W = feat_S.shape

    def pool(x):
        return x.reshape(B, C, H // 2, 2, W // 2, 2).mean(axis=(3, 5))

    fs = pool(feat_S)
    ft = pool(feat_T)
    fs = fs / jnp.maximum(jnp.linalg.norm(fs, axis=1, keepdims=True), 1e-12)
    ft = ft / jnp.maximum(jnp.linalg.norm(ft, axis=1, keepdims=True), 1e-12)
    fs = jnp.transpose(fs, (0, 2, 3, 1)).reshape(-1, C)
    ft = jnp.transpose(ft, (0, 2, 3, 1)).reshape(-1, C)
    proto_flat = proto_mem.reshape(-1, C) if kmean_num > 0 else proto_mem
    mask_np = np.asarray(proto_mask).reshape(-1).astype(bool)
    proto_sel = jnp.asarray(proto_flat)[jnp.asarray(np.nonzero(mask_np)[0])]
    s = fs @ proto_sel.T / temperature
    t = ft @ proto_sel.T / temperature
    log_p_s = jax.nn.log_softmax(s, axis=1)
    p_t = jax.nn.softmax(t, axis=1)
    log_p_t = jax.nn.log_softmax(t, axis=1)
    return jnp.sum(p_t * (log_p_t - log_p_s)) / fs.shape[0]


if __name__ == "__main__":
    key = jax.random.PRNGKey(0)
    k1, k2, k3, k4 = jax.random.split(key, 4)

    B, C, H, W = 2, 32, 16, 16          # feature maps (NCHW, like PyTorch)
    C_cls, km = 8, 4                    # prototype memory: (num_classes, kmean_num, C)

    feat_S = jax.random.normal(k1, (B, C, H, W), dtype=jnp.float32)
    feat_T = jax.random.normal(k2, (B, C, H, W), dtype=jnp.float32)
    proto_mem = jax.random.normal(k3, (C_cls, km, C), dtype=jnp.float32)
    proto_mask = (jax.random.uniform(k4, (C_cls, km)) > 0.4).astype(jnp.float32)
    proto_mask = proto_mask.at[0, 0].set(1.0)   # guarantee >=1 prototype selected

    loss = criterion_pixel_pair_g(feat_S, feat_T, proto_mem, proto_mask,
                                  kmean_num=km, temperature=0.1)
    loss = jax.block_until_ready(loss)

    # Reference uses the same bf16-rounded features the kernel ingests.
    fS_q = feat_S.astype(jnp.bfloat16).astype(jnp.float32)
    fT_q = feat_T.astype(jnp.bfloat16).astype(jnp.float32)
    ref = _reference(fS_q, fT_q, proto_mem, proto_mask, km, temperature=0.1)

    assert np.isfinite(float(loss)), "non-finite loss"
    np.testing.assert_allclose(float(loss), float(ref), rtol=2e-3, atol=1e-5)
    print("KERNEL_OK")
</pallas_src>

<mosaic_0001>
module attributes {stable_mosaic.version = 11 : i64} {
  func.func @_pixel_pair_kl_kernel(%arg0: i32, %arg1: i32, %arg2: memref<4x64x32xbf16, #tpu.memory_space<vmem>>, %arg3: memref<4x64x32xbf16, #tpu.memory_space<vmem>>, %arg4: memref<128x32xf32, #tpu.memory_space<vmem>>, %arg5: memref<1x128xf32, #tpu.memory_space<vmem>>, %arg6: memref<1x1x1xf32, #tpu.memory_space<vmem>>) attributes {dimension_semantics = [#tpu.dimension_semantics<parallel>, #tpu.dimension_semantics<arbitrary>], iteration_bounds = array<i64: 2, 1>, scalar_prefetch = 0 : i64, scratch_operands = 0 : i64, tpu.core_type = #tpu.core_type<tc>, window_params = [{transform_indices = @transform_0, window_bounds = array<i64: 4, 64, 32>}, {transform_indices = @transform_1, window_bounds = array<i64: 4, 64, 32>}, {pipeline_mode = #tpu.pipeline_mode<synchronous>, transform_indices = @transform_2, window_bounds = array<i64: 128, 32>}, {pipeline_mode = #tpu.pipeline_mode<synchronous>, transform_indices = @transform_3, window_bounds = array<i64: 1, 128>}, {transform_indices = @transform_4, window_bounds = array<i64: 1, 1, 1>}]} {
    %c0_i32 = arith.constant 0 : i32
    %0 = arith.cmpi eq, %arg1, %c0_i32 : i32
    %1 = arith.extui %0 : i1 to i32
    %c0_i32_0 = arith.constant 0 : i32
    %2 = arith.cmpi ne, %1, %c0_i32_0 : i32
    scf.if %2 {
      %cst_38 = arith.constant 0.000000e+00 : f32
      %109 = vector.broadcast %cst_38 : f32 to vector<1x1x1xf32>
      %c0_39 = arith.constant 0 : index
      %c0_40 = arith.constant 0 : index
      %c0_41 = arith.constant 0 : index
      %110 = vector.load %arg6[%c0_39, %c0_40, %c0_41] : memref<1x1x1xf32, #tpu.memory_space<vmem>>, vector<1x1x1xf32>
      tpu.vector_store %arg6[%c0_39, %c0_40, %c0_41], %109 {strides = array<i32>} : memref<1x1x1xf32, #tpu.memory_space<vmem>>, vector<1x1x1xf32>,
    } else {
    }
    %c0 = arith.constant 0 : index
    %c0_1 = arith.constant 0 : index
    %c0_2 = arith.constant 0 : index
    %3 = vector.load %arg2[%c0, %c0_1, %c0_2] : memref<4x64x32xbf16, #tpu.memory_space<vmem>>, vector<4x64x32xbf16>
    %4 = arith.extf %3 : vector<4x64x32xbf16> to vector<4x64x32xf32>
    %c0_3 = arith.constant 0 : index
    %c0_4 = arith.constant 0 : index
    %c0_5 = arith.constant 0 : index
    %5 = vector.load %arg3[%c0_3, %c0_4, %c0_5] : memref<4x64x32xbf16, #tpu.memory_space<vmem>>, vector<4x64x32xbf16>
    %6 = arith.extf %5 : vector<4x64x32xbf16> to vector<4x64x32xf32>
    %c0_6 = arith.constant 0 : index
    %c0_7 = arith.constant 0 : index
    %7 = vector.load %arg4[%c0_6, %c0_7] : memref<128x32xf32, #tpu.memory_space<vmem>>, vector<128x32xf32>
    %c0_8 = arith.constant 0 : index
    %c0_9 = arith.constant 0 : index
    %8 = vector.load %arg5[%c0_8, %c0_9] : memref<1x128xf32, #tpu.memory_space<vmem>>, vector<1x128xf32>
    %cst = arith.constant 0.000000e+00 : f32
    %9 = vector.broadcast %cst : f32 to vector<1x128xf32>
    %10 = arith.cmpf ogt, %8, %9 : vector<1x128xf32>
    %11 = vector.extract_strided_slice %4 {offsets = [0, 0, 0], sizes = [1, 64, 32], strides = [1, 1, 1]} : vector<4x64x32xf32> to vector<1x64x32xf32>
    %12 = vector.shape_cast %11 : vector<1x64x32xf32> to vector<64x32xf32>
    %13 = vector.extract_strided_slice %4 {offsets = [1, 0, 0], sizes = [1, 64, 32], strides = [1, 1, 1]} : vector<4x64x32xf32> to vector<1x64x32xf32>
    %14 = vector.shape_cast %13 : vector<1x64x32xf32> to vector<64x32xf32>
    %15 = arith.addf %12, %14 : vector<64x32xf32>
    %16 = vector.extract_strided_slice %4 {offsets = [2, 0, 0], sizes = [1, 64, 32], strides = [1, 1, 1]} : vector<4x64x32xf32> to vector<1x64x32xf32>
    %17 = vector.shape_cast %16 : vector<1x64x32xf32> to vector<64x32xf32>
    %18 = arith.addf %15, %17 : vector<64x32xf32>
    %19 = vector.extract_strided_slice %4 {offsets = [3, 0, 0], sizes = [1, 64, 32], strides = [1, 1, 1]} : vector<4x64x32xf32> to vector<1x64x32xf32>
    %20 = vector.shape_cast %19 : vector<1x64x32xf32> to vector<64x32xf32>
    %21 = arith.addf %18, %20 : vector<64x32xf32>
    %cst_10 = arith.constant 2.500000e-01 : f32
    %22 = vector.broadcast %cst_10 : f32 to vector<64x32xf32>
    %23 = arith.mulf %21, %22 : vector<64x32xf32>
    %24 = vector.extract_strided_slice %6 {offsets = [0, 0, 0], sizes = [1, 64, 32], strides = [1, 1, 1]} : vector<4x64x32xf32> to vector<1x64x32xf32>
    %25 = vector.shape_cast %24 : vector<1x64x32xf32> to vector<64x32xf32>
    %26 = vector.extract_strided_slice %6 {offsets = [1, 0, 0], sizes = [1, 64, 32], strides = [1, 1, 1]} : vector<4x64x32xf32> to vector<1x64x32xf32>
    %27 = vector.shape_cast %26 : vector<1x64x32xf32> to vector<64x32xf32>
    %28 = arith.addf %25, %27 : vector<64x32xf32>
    %29 = vector.extract_strided_slice %6 {offsets = [2, 0, 0], sizes = [1, 64, 32], strides = [1, 1, 1]} : vector<4x64x32xf32> to vector<1x64x32xf32>
    %30 = vector.shape_cast %29 : vector<1x64x32xf32> to vector<64x32xf32>
    %31 = arith.addf %28, %30 : vector<64x32xf32>
    %32 = vector.extract_strided_slice %6 {offsets = [3, 0, 0], sizes = [1, 64, 32], strides = [1, 1, 1]} : vector<4x64x32xf32> to vector<1x64x32xf32>
    %33 = vector.shape_cast %32 : vector<1x64x32xf32> to vector<64x32xf32>
    %34 = arith.addf %31, %33 : vector<64x32xf32>
    %cst_11 = arith.constant 2.500000e-01 : f32
    %35 = vector.broadcast %cst_11 : f32 to vector<64x32xf32>
    %36 = arith.mulf %34, %35 : vector<64x32xf32>
    %37 = arith.mulf %23, %23 : vector<64x32xf32>
    %cst_12 = arith.constant dense<0.000000e+00> : vector<64xf32>
    %38 = vector.multi_reduction <add>, %37, %cst_12 [1] : vector<64x32xf32> to vector<64xf32>
    %39 = vector.shape_cast %38 : vector<64xf32> to vector<64x1xf32>
    %cst_13 = arith.constant 9.99999996E-13 : f32
    %cst_14 = arith.constant 9.99999996E-13 : f32
    %40 = arith.mulf %cst_13, %cst_14 : f32
    %41 = vector.broadcast %40 : f32 to vector<64x1xf32>
    %42 = arith.maximumf %39, %41 : vector<64x1xf32>
    %43 = math.rsqrt %42 : vector<64x1xf32>
    %44 = vector.broadcast %43 : vector<64x1xf32> to vector<64x32xf32>
    %45 = arith.mulf %23, %44 : vector<64x32xf32>
    %46 = arith.mulf %36, %36 : vector<64x32xf32>
    %cst_15 = arith.constant dense<0.000000e+00> : vector<64xf32>
    %47 = vector.multi_reduction <add>, %46, %cst_15 [1] : vector<64x32xf32> to vector<64xf32>
    %48 = vector.shape_cast %47 : vector<64xf32> to vector<64x1xf32>
    %cst_16 = arith.constant 9.99999996E-13 : f32
    %cst_17 = arith.constant 9.99999996E-13 : f32
    %49 = arith.mulf %cst_16, %cst_17 : f32
    %50 = vector.broadcast %49 : f32 to vector<64x1xf32>
    %51 = arith.maximumf %48, %50 : vector<64x1xf32>
    %52 = math.rsqrt %51 : vector<64x1xf32>
    %53 = vector.broadcast %52 : vector<64x1xf32> to vector<64x32xf32>
    %54 = arith.mulf %36, %53 : vector<64x32xf32>
    %cst_18 = arith.constant dense<0.000000e+00> : vector<64x128xf32>
    %55 = tpu.matmul %45, %7, %cst_18 {dimension_numbers = #tpu.dot_dimension_numbers<[1], [1], [0], [0], [0, 0, 1, 0], [], []>} : vector<64x32xf32>, vector<128x32xf32>, vector<64x128xf32> -> vector<64x128xf32>
    %cst_19 = arith.constant 1.000000e+01 : f32
    %56 = vector.broadcast %cst_19 : f32 to vector<64x128xf32>
    %57 = arith.mulf %55, %56 : vector<64x128xf32>
    %cst_20 = arith.constant dense<0.000000e+00> : vector<64x128xf32>
    %58 = tpu.matmul %54, %7, %cst_20 {dimension_numbers = #tpu.dot_dimension_numbers<[1], [1], [0], [0], [0, 0, 1, 0], [], []>} : vector<64x32xf32>, vector<128x32xf32>, vector<64x128xf32> -> vector<64x128xf32>
    %cst_21 = arith.constant 1.000000e+01 : f32
    %59 = vector.broadcast %cst_21 : f32 to vector<64x128xf32>
    %60 = arith.mulf %58, %59 : vector<64x128xf32>
    %cst_22 = arith.constant -1.000000e+30 : f32
    %61 = vector.shape_cast %10 : vector<1x128xi1> to vector<1x128xi1>
    %62 = vector.broadcast %61 : vector<1x128xi1> to vector<64x128xi1>
    %63 = vector.broadcast %cst_22 : f32 to vector<64x128xf32>
    %64 = arith.select %62, %57, %63 : vector<64x128xi1>, vector<64x128xf32>
    %cst_23 = arith.constant -1.000000e+30 : f32
    %65 = vector.shape_cast %10 : vector<1x128xi1> to vector<1x128xi1>
    %66 = vector.broadcast %65 : vector<1x128xi1> to vector<64x128xi1>
    %67 = vector.broadcast %cst_23 : f32 to vector<64x128xf32>
    %68 = arith.select %66, %60, %67 : vector<64x128xi1>, vector<64x128xf32>
    %cst_24 = arith.constant dense<0xFF800000> : vector<64xf32>
    %69 = vector.multi_reduction <maximumf>, %64, %cst_24 [1] : vector<64x128xf32> to vector<64xf32>
    %70 = vector.shape_cast %69 : vector<64xf32> to vector<64x1xf32>
    %71 = vector.broadcast %70 : vector<64x1xf32> to vector<64x128xf32>
    %72 = arith.subf %64, %71 : vector<64x128xf32>
    %73 = math.exp %72 : vector<64x128xf32>
    %cst_25 = arith.constant dense<0.000000e+00> : vector<64xf32>
    %74 = vector.multi_reduction <add>, %73, %cst_25 [1] : vector<64x128xf32> to vector<64xf32>
    %75 = vector.shape_cast %74 : vector<64xf32> to vector<64x1xf32>
    %76 = math.log %75 : vector<64x1xf32>
    %77 = vector.broadcast %76 : vector<64x1xf32> to vector<64x128xf32>
    %78 = arith.subf %72, %77 : vector<64x128xf32>
    %cst_26 = arith.constant dense<0xFF800000> : vector<64xf32>
    %79 = vector.multi_reduction <maximumf>, %68, %cst_26 [1] : vector<64x128xf32> to vector<64xf32>
    %80 = vector.shape_cast %79 : vector<64xf32> to vector<64x1xf32>
    %81 = vector.broadcast %80 : vector<64x1xf32> to vector<64x128xf32>
    %82 = arith.subf %68, %81 : vector<64x128xf32>
    %83 = math.exp %82 : vector<64x128xf32>
    %cst_27 = arith.constant dense<0.000000e+00> : vector<64xf32>
    %84 = vector.multi_reduction <add>, %83, %cst_27 [1] : vector<64x128xf32> to vector<64xf32>
    %85 = vector.shape_cast %84 : vector<64xf32> to vector<64x1xf32>
    %86 = tpu.reciprocal %85 {approx = true} : vector<64x1xf32> -> vector<64x1xf32>
    %87 = vector.broadcast %86 : vector<64x1xf32> to vector<64x128xf32>
    %88 = arith.mulf %83, %87 : vector<64x128xf32>
    %89 = math.log %85 : vector<64x1xf32>
    %90 = vector.broadcast %89 : vector<64x1xf32> to vector<64x128xf32>
    %91 = arith.subf %82, %90 : vector<64x128xf32>
    %92 = arith.subf %91, %78 : vector<64x128xf32>
    %93 = arith.mulf %88, %92 : vector<64x128xf32>
    %cst_28 = arith.constant 0.000000e+00 : f32
    %94 = vector.shape_cast %10 : vector<1x128xi1> to vector<1x128xi1>
    %95 = vector.broadcast %94 : vector<1x128xi1> to vector<64x128xi1>
    %96 = vector.broadcast %cst_28 : f32 to vector<64x128xf32>
    %97 = arith.select %95, %93, %96 : vector<64x128xi1>, vector<64x128xf32>
    %c0_29 = arith.constant 0 : index
    %c0_30 = arith.constant 0 : index
    %c0_31 = arith.constant 0 : index
    %98 = vector.load %arg6[%c0_29, %c0_30, %c0_31] : memref<1x1x1xf32, #tpu.memory_space<vmem>>, vector<1x1x1xf32>
    %99 = vector.shape_cast %97 : vector<64x128xf32> to vector<1x64x128xf32>
    %cst_32 = arith.constant dense<0.000000e+00> : vector<1xf32>
    %100 = vector.multi_reduction <add>, %99, %cst_32 [1, 2] : vector<1x64x128xf32> to vector<1xf32>
    %101 = vector.shape_cast %100 : vector<1xf32> to vector<1x1x1xf32>
    %102 = vector.extract %101[0, 0, 0] : f32 from vector<1x1x1xf32>
    %103 = vector.broadcast %102 : f32 to vector<1x1x1xf32>
    %104 = arith.addf %98, %103 : vector<1x1x1xf32>
    %c0_33 = arith.constant 0 : index
    %c0_34 = arith.constant 0 : index
    %c0_35 = arith.constant 0 : index
    %105 = vector.load %arg6[%c0_33, %c0_34, %c0_35] : memref<1x1x1xf32, #tpu.memory_space<vmem>>, vector<1x1x1xf32>
    tpu.vector_store %arg6[%c0_33, %c0_34, %c0_35], %104 {strides = array<i32>} : memref<1x1x1xf32, #tpu.memory_space<vmem>>, vector<1x1x1xf32>,
    %c0_i32_36 = arith.constant 0 : i32
    %106 = arith.cmpi eq, %arg1, %c0_i32_36 : i32
    %107 = arith.extui %106 : i1 to i32
    %c0_i32_37 = arith.constant 0 : i32
    %108 = arith.cmpi ne, %107, %c0_i32_37 : i32
    scf.if %108 {
      %c0_38 = arith.constant 0 : index
      %c0_39 = arith.constant 0 : index
      %c0_40 = arith.constant 0 : index
      %109 = vector.load %arg6[%c0_38, %c0_39, %c0_40] : memref<1x1x1xf32, #tpu.memory_space<vmem>>, vector<1x1x1xf32>
      %cst_41 = arith.constant 7.812500e-03 : f32
      %110 = vector.broadcast %cst_41 : f32 to vector<1x1x1xf32>
      %111 = arith.mulf %109, %110 : vector<1x1x1xf32>
      %c0_42 = arith.constant 0 : index
      %c0_43 = arith.constant 0 : index
      %c0_44 = arith.constant 0 : index
      %112 = vector.load %arg6[%c0_42, %c0_43, %c0_44] : memref<1x1x1xf32, #tpu.memory_space<vmem>>, vector<1x1x1xf32>
      tpu.vector_store %arg6[%c0_42, %c0_43, %c0_44], %111 {strides = array<i32>} : memref<1x1x1xf32, #tpu.memory_space<vmem>>, vector<1x1x1xf32>,
    } else {
    }
    return
  }
  func.func @transform_0(%arg0: i32, %arg1: i32) -> (i32, i32, i32) {
    %c1_i32 = arith.constant 1 : i32
    %0 = arith.muli %arg0, %c1_i32 : i32
    %1 = arith.addi %0, %arg1 : i32
    %c0_i32 = arith.constant 0 : i32
    %c0_i32_0 = arith.constant 0 : i32
    %c0_i32_1 = arith.constant 0 : i32
    return %c0_i32, %1, %c0_i32_0 : i32, i32, i32
  }
  func.func @transform_1(%arg0: i32, %arg1: i32) -> (i32, i32, i32) {
    %c1_i32 = arith.constant 1 : i32
    %0 = arith.muli %arg0, %c1_i32 : i32
    %1 = arith.addi %0, %arg1 : i32
    %c0_i32 = arith.constant 0 : i32
    %c0_i32_0 = arith.constant 0 : i32
    %c0_i32_1 = arith.constant 0 : i32
    return %c0_i32, %1, %c0_i32_0 : i32, i32, i32
  }
  func.func @transform_2(%arg0: i32, %arg1: i32) -> (i32, i32) {
    %c0_i32 = arith.constant 0 : i32
    %c0_i32_0 = arith.constant 0 : i32
    %c0_i32_1 = arith.constant 0 : i32
    return %c0_i32, %c0_i32_0 : i32, i32
  }
  func.func @transform_3(%arg0: i32, %arg1: i32) -> (i32, i32) {
    %c0_i32 = arith.constant 0 : i32
    %c0_i32_0 = arith.constant 0 : i32
    %c0_i32_1 = arith.constant 0 : i32
    return %c0_i32, %c0_i32_0 : i32, i32
  }
  func.func @transform_4(%arg0: i32, %arg1: i32) -> (i32, i32, i32) {
    %c0_i32 = arith.constant 0 : i32
    %c0_i32_0 = arith.constant 0 : i32
    %c0_i32_1 = arith.constant 0 : i32
    return %arg0, %c0_i32, %c0_i32_0 : i32, i32, i32
  }
}

</mosaic_0001>

<bundles_post_ra>
// kernel: criterion_pixel_pair_g.1
= control target key start
LH: loop header
LB: loop body
LE: loop exit
PB: predicated region body
PF: predicated region fallthrough
CT: control target
= control target key end

     0   :  { %s2227_s15 = smov 0   ;;  %s2229_s16 = smov 0   ;;  %s2863_s0 = inlined_call_operand.vmem [shape: bf16[4,128,32], index: 0, kind: input, shape index: {}]   ;;  %s2864_s1 = inlined_call_operand.vmem [shape: bf16[4,128,32], index: 1, kind: input, shape index: {}]   ;;  %s2865_s2 = inlined_call_operand.vmem [shape: f32[128,32], index: 2, kind: input, shape index: {}]   ;;  %s2866_s3 = inlined_call_operand.vmem [shape: f32[1,128], index: 3, kind: input, shape index: {}]   ;;  %s2867_s4 = inlined_call_operand.vmem [shape: f32[2,1,1], index: 4, kind: output, shape index: {}]  }
   0x1   :  { %s2231_s17 = smov 0   ;;  %s2233_s18 = smov 0  }
   0x2   :  { %s2235_s19 = smov 0  }
   0x3 LB: > { %s26_s20 = sadd.s32 1, %s2194_s18  ;;  %p42_p1 = scmp.ne.s32.totalorder %s2186_s16, %s2182_s15  ;;  %s2198_s19 = sphi %s2235_s19, %s14_s19   ;;  %s2194_s18 = sphi %s2233_s18, %s2874_s18   ;;  %s2190_s17 = sphi %s2231_s17, %s2873_s17   ;;  %s2186_s16 = sphi %s2229_s16, %s2872_s16   ;;  %s2182_s15 = sphi %s2227_s15, %s2871_s15  }
   0x4   : > { %p28_p0 = scmp.ge.s32.totalorder %s26_s20, 2  ;;  %p43_p2 = scmp.eq.s32.totalorder %s2198_s19, 0 }
   0x5   : > { %s35_s23 = sadd.s32 1, %s2186_s16  ;;  %p1552_p5 = scmp.ge.s32.totalorder %s2198_s19, 2 }
   0x6   : > { %s2876_s20 = smov (%p28_p0, %s26_s20), 0  ;;  %p2258_p3 = por %p43_p2, %p42_p1 }
   0x7   : > { %s32_s22 = ssub.s32 %s2194_s18, %s2876_s20  ;;  %170 = sbr.rel (%p1552_p5) target bundleno = 38 (0x26), region = 24 }
   0x8   : > { %p33_p4 = scmp.eq.s32.totalorder %s32_s22, 0 }
   0xa   : > { %s2266_s24 = scalar_select %p33_p4, %s2186_s16, %s35_s23  }
   0xe   : > { %173 = sbr.rel (!%p2258_p3) target bundleno = 26 (0x1a), region = 28  ;;  %s175_s25 = sand.u32 (%p2258_p3), 1, %s2186_s16  }
   0xf   : > { %s1612_s26 = sshll.u32 (%p2258_p3), %s2194_s18, 5  ;;  %s1553_s27 = sshll.u32 (%p2258_p3), %s175_s25, 7 }
  0x10   : > { %s2276_s30 = scalar_lea.vmem (%p2258_p3), %s2863_s0, %s1612_s26  ;;  %s177_s5 = scalar_lea.vmem (%p2258_p3), [#allocation2], %s1553_s27 }
  0x11   : > { %v197_v0 = vld [vmem:[%s2276_s30] sm:$0xff] (%p2258_p3)   ;;  %v201_v1 = vld [vmem:[%s2276_s30 + $0x8] sm:$0xff] (%p2258_p3)   ;;  %v205_v2 = vld [vmem:[%s2276_s30 + $0x10] sm:$0xff] (%p2258_p3)  }
  0x12   : > { %198 = vst [vmem:[%s177_s5] sm:$0xff] (%p2258_p3), %v197_v0   ;;  %202 = vst [vmem:[%s177_s5 + $0x8] sm:$0xff] (%p2258_p3), %v201_v1   ;;  %v209_v3 = vld [vmem:[%s2276_s30 + $0x18] sm:$0xff] (%p2258_p3)   ;;  %v213_v4 = vld [vmem:[%s2276_s30 + $0x40] sm:$0xff] (%p2258_p3)  }
  0x13   : > { %206 = vst [vmem:[%s177_s5 + $0x10] sm:$0xff] (%p2258_p3), %v205_v2   ;;  %v217_v5 = vld [vmem:[%s2276_s30 + $0x48] sm:$0xff] (%p2258_p3)   ;;  %210 = vst [vmem:[%s177_s5 + $0x18] sm:$0xff] (%p2258_p3), %v209_v3   ;;  %v221_v6 = vld [vmem:[%s2276_s30 + $0x50] sm:$0xff] (%p2258_p3)  }
  0x14   : > { %214 = vst [vmem:[%s177_s5 + $0x20] sm:$0xff] (%p2258_p3), %v213_v4   ;;  %218 = vst [vmem:[%s177_s5 + $0x28] sm:$0xff] (%p2258_p3), %v217_v5   ;;  %v225_v7 = vld [vmem:[%s2276_s30 + $0x58] sm:$0xff] (%p2258_p3)   ;;  %v229_v8 = vld [vmem:[%s2276_s30 + $0x80] sm:$0xff] (%p2258_p3)  }
  0x15   : > { %222 = vst [vmem:[%s177_s5 + $0x30] sm:$0xff] %v221_v6   ;;  %226 = vst [vmem:[%s177_s5 + $0x38] sm:$0xff] %v225_v7   ;;  %v233_v9 = vld [vmem:[%s2276_s30 + $0x88] sm:$0xff]   ;;  %v237_v10 = vld [vmem:[%s2276_s30 + $0x90] sm:$0xff]  }
  0x16   : > { %230 = vst [vmem:[%s177_s5 + $0x40] sm:$0xff] %v229_v8   ;;  %v241_v11 = vld [vmem:[%s2276_s30 + $0x98] sm:$0xff]   ;;  %234 = vst [vmem:[%s177_s5 + $0x48] sm:$0xff] %v233_v9   ;;  %v245_v12 = vld [vmem:[%s2276_s30 + $0xc0] sm:$0xff]  }
  0x17   : > { %238 = vst [vmem:[%s177_s5 + $0x50] sm:$0xff] %v237_v10   ;;  %242 = vst [vmem:[%s177_s5 + $0x58] sm:$0xff] %v241_v11   ;;  %v249_v13 = vld [vmem:[%s2276_s30 + $0xc8] sm:$0xff]   ;;  %v253_v14 = vld [vmem:[%s2276_s30 + $0xd0] sm:$0xff]  }
  0x18   : > { %246 = vst [vmem:[%s177_s5 + $0x60] sm:$0xff] %v245_v12   ;;  %250 = vst [vmem:[%s177_s5 + $0x68] sm:$0xff] %v249_v13   ;;  %v257_v15 = vld [vmem:[%s2276_s30 + $0xd8] sm:$0xff]  }
  0x19   : > { %254 = vst [vmem:[%s177_s5 + $0x70] sm:$0xff] %v253_v14   ;;  %258 = vst [vmem:[%s177_s5 + $0x78] sm:$0xff] %v257_v15  }
  0x1a PF: > { %347 = sbr.rel (!%p2258_p3) target bundleno = 38 (0x26), region = 69  ;;  %s349_s6 = sand.u32 (%p2258_p3), 1, %s2186_s16  }
  0x1b   : > { %s1613_s7 = sshll.u32 (%p2258_p3), %s2194_s18, 5  ;;  %s1556_s8 = sshll.u32 (%p2258_p3), %s349_s6, 7 }
  0x1c   : > { %s2301_s11 = scalar_lea.vmem (%p2258_p3), %s2864_s1, %s1613_s7  ;;  %s351_s12 = scalar_lea.vmem (%p2258_p3), [#allocation3], %s1556_s8 }
  0x1d   : > { %v371_v16 = vld [vmem:[%s2301_s11] sm:$0xff] (%p2258_p3)   ;;  %v375_v17 = vld [vmem:[%s2301_s11 + $0x8] sm:$0xff] (%p2258_p3)   ;;  %v379_v18 = vld [vmem:[%s2301_s11 + $0x10] sm:$0xff] (%p2258_p3)  }
  0x1e   : > { %372 = vst [vmem:[%s351_s12] sm:$0xff] (%p2258_p3), %v371_v16   ;;  %376 = vst [vmem:[%s351_s12 + $0x8] sm:$0xff] (%p2258_p3), %v375_v17   ;;  %v383_v19 = vld [vmem:[%s2301_s11 + $0x18] sm:$0xff] (%p2258_p3)   ;;  %v387_v20 = vld [vmem:[%s2301_s11 + $0x40] sm:$0xff] (%p2258_p3)  }
  0x1f   : > { %380 = vst [vmem:[%s351_s12 + $0x10] sm:$0xff] (%p2258_p3), %v379_v18   ;;  %v391_v21 = vld [vmem:[%s2301_s11 + $0x48] sm:$0xff] (%p2258_p3)   ;;  %384 = vst [vmem:[%s351_s12 + $0x18] sm:$0xff] (%p2258_p3), %v383_v19   ;;  %v395_v22 = vld [vmem:[%s2301_s11 + $0x50] sm:$0xff] (%p2258_p3)  }
  0x20   : > { %388 = vst [vmem:[%s351_s12 + $0x20] sm:$0xff] (%p2258_p3), %v387_v20   ;;  %392 = vst [vmem:[%s351_s12 + $0x28] sm:$0xff] (%p2258_p3), %v391_v21   ;;  %v399_v23 = vld [vmem:[%s2301_s11 + $0x58] sm:$0xff] (%p2258_p3)   ;;  %v403_v24 = vld [vmem:[%s2301_s11 + $0x80] sm:$0xff] (%p2258_p3)  }
  0x21   : > { %396 = vst [vmem:[%s351_s12 + $0x30] sm:$0xff] %v395_v22   ;;  %400 = vst [vmem:[%s351_s12 + $0x38] sm:$0xff] %v399_v23   ;;  %v407_v25 = vld [vmem:[%s2301_s11 + $0x88] sm:$0xff]   ;;  %v411_v26 = vld [vmem:[%s2301_s11 + $0x90] sm:$0xff]  }
  0x22   : > { %404 = vst [vmem:[%s351_s12 + $0x40] sm:$0xff] %v403_v24   ;;  %v415_v27 = vld [vmem:[%s2301_s11 + $0x98] sm:$0xff]   ;;  %408 = vst [vmem:[%s351_s12 + $0x48] sm:$0xff] %v407_v25   ;;  %v419_v28 = vld [vmem:[%s2301_s11 + $0xc0] sm:$0xff]  }
  0x23   : > { %412 = vst [vmem:[%s351_s12 + $0x50] sm:$0xff] %v411_v26   ;;  %416 = vst [vmem:[%s351_s12 + $0x58] sm:$0xff] %v415_v27   ;;  %v423_v29 = vld [vmem:[%s2301_s11 + $0xc8] sm:$0xff]   ;;  %v427_v30 = vld [vmem:[%s2301_s11 + $0xd0] sm:$0xff]  }
  0x24   : > { %420 = vst [vmem:[%s351_s12 + $0x60] sm:$0xff] %v419_v28   ;;  %424 = vst [vmem:[%s351_s12 + $0x68] sm:$0xff] %v423_v29   ;;  %v431_v31 = vld [vmem:[%s2301_s11 + $0xd8] sm:$0xff]  }
  0x25   : > { %428 = vst [vmem:[%s351_s12 + $0x70] sm:$0xff] %v427_v30   ;;  %432 = vst [vmem:[%s351_s12 + $0x78] sm:$0xff] %v431_v31  }
  0x26 PF: > { %p1559_p6 = scmp.ge.s32.totalorder %s2198_s19, 1  ;;  %p520_p7 = scmp.lt.s32.totalorder %s2198_s19, 3 }
  0x28   : > { %p521_p8 = pnand %p1559_p6, %p520_p7 }
  0x29   : > { %s527_s13 = sand.u32 (!%p521_p8), 1, %s2182_s15   ;;  %vm792_vm0 = vcmask (!%p521_p8), 261120   ;;  %v702_v32 = vld [vmem:[%s2865_s2] sm:$0xff] (!%p521_p8)  ;;  %v703_v33 = vld [vmem:[%s2865_s2 + $0x8] sm:$0xff] (!%p521_p8)  ;;  %v704_v34 = vld [vmem:[%s2865_s2 + $0x10] sm:$0xff] (!%p521_p8)  ;;  %p565_p9 = scmp.lt.s32.totalorder (!%p521_p8), %s2190_s17, 1 }
  0x2a   : > { %524 = sbr.rel (%p521_p8) target bundleno = 1009 (0x3f1), region = 110  ;;  %s1560_s27 = sshll.u32 (!%p521_p8), %s527_s13, 7  ;;  %v1908_v35 = vpack.c.bf16 (!%p521_p8), %v703_v33, %v702_v32  ;;  %vm2333_vm1 = vmpackc.low (!%p521_p8), %vm792_vm0, %vm792_vm0  ;;  %v705_v37 = vld [vmem:[%s2865_s2 + $0x18] sm:$0xff] (!%p521_p8)  ;;  %v706_v38 = vld [vmem:[%s2865_s2 + $0x20] sm:$0xff] (!%p521_p8)  ;;  %vm572_vm4 = vcmask (!%p521_p8), 0  }
  0x2b   : > { %v2343_v39 = vpack.c.bf16 (!%p521_p8), %v705_v37, %v704_v34  ;;  %v707_v40 = vld [vmem:[%s2865_s2 + $0x28] sm:$0xff] (!%p521_p8)  ;;  %v708_v41 = vld [vmem:[%s2865_s2 + $0x30] sm:$0xff] (!%p521_p8)  ;;  %v709_v42 = vld [vmem:[%s2865_s2 + $0x38] sm:$0xff] (!%p521_p8)  ;;  %s2354_s11 = scalar_lea.vmem (!%p521_p8), [#allocation2], %s1560_s27  ;;  %s2368_s12 = scalar_lea.vmem (!%p521_p8), [#allocation3], %s1560_s27 }
  0x2c   : > { %v1615_v43 = vld [vmem:[%s2354_s11] sm:$0xff] (!%p521_p8)   ;;  %1910 = vmatprep.subr.msk.bf16.mxu0 (!%p521_p8), %vm2333_vm1, %v1908_v35  ;;  %1958 = vmatprep.subr.msk.bf16.mxu1 (!%p521_p8), %vm2333_vm1, %v1908_v35  ;;  %v2363_v46 = vpack.c.bf16 (!%p521_p8), %v707_v40, %v706_v38  ;;  %v2365_v47 = vpack.c.bf16 (!%p521_p8), %v709_v42, %v708_v41  ;;  %v1757_v1 = vld [vmem:[%s2368_s12 + $0x8] sm:$0xff] (!%p521_p8)  }
  0x2d   : > { %v1745_v44 = vld [vmem:[%s2354_s11 + $0x20] sm:$0xff] (!%p521_p8)   ;;  %v1617_v48 = vunpack.c.h.bf16 (!%p521_p8), %v1615_v43  ;;  %v1616_v52 = vunpack.c.l.bf16 (!%p521_p8), %v1615_v43  ;;  %1913 = vmatpush3.bf16.xpose.msk.msra.mxu0 (!%p521_p8), %vm2333_vm1, %v1908_v35  ;;  %1961 = vmatpush3.bf16.xpose.msk.msra.mxu1 (!%p521_p8), %vm2333_vm1, %v1908_v35  ;;  %v1761_v2 = vld [vmem:[%s2368_s12 + $0x28] sm:$0xff] (!%p521_p8)   ;;  %v1684_v16 = vunpack.c.l.bf16 (!%p521_p8), %v1757_v1  ;;  %v1685_v41 = vunpack.c.h.bf16 (!%p521_p8), %v1757_v1 }
  0x2e   : > { %v1749_v45 = vld [vmem:[%s2354_s11 + $0x40] sm:$0xff] (!%p521_p8)   ;;  %v1633_v49 = vunpack.c.h.bf16 (!%p521_p8), %v1745_v44  ;;  %v1632_v56 = vunpack.c.l.bf16 (!%p521_p8), %v1745_v44  ;;  %1916 = vmatprep.subr.msk.bf16.mxu0 (!%p521_p8), %vm2333_vm1, %v2343_v39  ;;  %1964 = vmatprep.subr.msk.bf16.mxu1 (!%p521_p8), %vm2333_vm1, %v2343_v39  ;;  %v2387_v7 = vld [vmem:[%s2368_s12 + $0x48] sm:$0xff] (!%p521_p8)   ;;  %v1700_v17 = vunpack.c.l.bf16 (!%p521_p8), %v1761_v2 }
  0x2f   : > { %v1649_v50 = vunpack.c.h.bf16 (!%p521_p8), %v1749_v45  ;;  %v1753_v51 = vld [vmem:[%s2354_s11 + $0x60] sm:$0xff] (!%p521_p8)   ;;  %v1648_v57 = vunpack.c.l.bf16 (!%p521_p8), %v1749_v45  ;;  %v2390_v8 = vld [vmem:[%s2368_s12 + $0x68] sm:$0xff] (!%p521_p8)   ;;  %v1716_v22 = vunpack.c.l.bf16 (!%p521_p8), %v2387_v7  ;;  %v1701_v45 = vunpack.c.h.bf16 (!%p521_p8), %v1761_v2 }
  0x30   : > { %v1679_v53 = vld [vmem:[%s2368_s12] sm:$0xff] (!%p521_p8)   ;;  %v1665_v55 = vunpack.c.h.bf16 (!%p521_p8), %v1753_v51  ;;  %v1664_v58 = vunpack.c.l.bf16 (!%p521_p8), %v1753_v51  ;;  %v721_v61 = vadd.f32 (!%p521_p8), %v1633_v49, %v1617_v48  ;;  %v720_v3 = vadd.f32 (!%p521_p8), %v1632_v56, %v1616_v52  ;;  %v2393_v13 = vld [vmem:[%s2354_s11 + $0x8] sm:$0xff] (!%p521_p8)   ;;  %v1758_v56 = vld [vmem:[%s2368_s12 + $0x10] sm:$0xff] (!%p521_p8)  }
  0x31   : > { %v1760_v54 = vld [vmem:[%s2368_s12 + $0x20] sm:$0xff]   ;;  %v1681_v62 = vunpack.c.h.bf16 %v1679_v53  ;;  %v1680_v5 = vunpack.c.l.bf16 %v1679_v53  ;;  %v2396_v18 = vld [vmem:[%s2354_s11 + $0x28] sm:$0xff]   ;;  %v1732_v23 = vunpack.c.l.bf16 %v2390_v8  ;;  %v754_v27 = vadd.f32 %v1700_v17, %v1684_v16  ;;  %s2878_s17 = smov (!%p565_p9, %s2190_s17), 1 }
  0x32   : > { %v1764_v59 = vld [vmem:[%s2368_s12 + $0x40] sm:$0xff]   ;;  %v1697_v63 = vunpack.c.h.bf16 %v1760_v54  ;;  %v1696_v6 = vunpack.c.l.bf16 %v1760_v54  ;;  %v729_v9 = vadd.f32 %v1649_v50, %v721_v61  ;;  %v728_v14 = vadd.f32 %v1648_v57, %v720_v3  ;;  %v2399_v19 = vld [vmem:[%s2354_s11 + $0x48] sm:$0xff]   ;;  %v1762_v61 = vld [vmem:[%s2368_s12 + $0x30] sm:$0xff]   ;;  %s567_s13 = scalar_lea.vmem %s2867_s4, %s2878_s17 }
  0x33   : > { %v1768_v60 = vld [vmem:[%s2368_s12 + $0x60] sm:$0xff]   ;;  %v1713_v0 = vunpack.c.h.bf16 %v1764_v59  ;;  %v1712_v11 = vunpack.c.l.bf16 %v1764_v59  ;;  %v2404_v24 = vld [vmem:[%s2354_s11 + $0x68] sm:$0xff]   ;;  %v1620_v28 = vunpack.c.l.bf16 %v2393_v13  ;;  %v1636_v31 = vunpack.c.l.bf16 %v2396_v18  ;;  %v2457_v3 = vld [vmem:[%s2368_s12 + $0x70] sm:$0xff]  }
  0x34   : > { %v1729_v4 = vunpack.c.h.bf16 %v1768_v60  ;;  %v753_v10 = vadd.f32 %v1697_v63, %v1681_v62  ;;  %v1728_v12 = vunpack.c.l.bf16 %v1768_v60  ;;  %v752_v15 = vadd.f32 %v1696_v6, %v1680_v5  ;;  %v2449_v62 = vld [vmem:[%s2368_s12 + $0x50] sm:$0xff]  }
  0x35   : > { %v737_v20 = vadd.f32 %v1665_v55, %v729_v9  ;;  %v736_v25 = vadd.f32 %v1664_v58, %v728_v14  ;;  %v1652_v32 = vunpack.c.l.bf16 %v2399_v19  ;;  %1919 = vmatpush3.bf16.xpose.msk.msra.mxu0 %vm2333_vm1, %v2343_v39  ;;  %1967 = vmatpush3.bf16.xpose.msk.msra.mxu1 %vm2333_vm1, %v2343_v39  ;;  %v762_v35 = vadd.f32 %v1716_v22, %v754_v27  ;;  %v1747_v9 = vld [vmem:[%s2354_s11 + $0x30] sm:$0xff]  }
  0x36   : > { %v761_v21 = vadd.f32 %v1713_v0, %v753_v10  ;;  %v760_v26 = vadd.f32 %v1712_v11, %v752_v15  ;;  %v1668_v37 = vunpack.c.l.bf16 %v2404_v24  ;;  %1922 = vmatprep.subr.msk.bf16.mxu0 %vm2333_vm1, %v2363_v46  ;;  %1970 = vmatprep.subr.msk.bf16.mxu1 %vm2333_vm1, %v2363_v46  ;;  %v722_v39 = vadd.f32 %v1636_v31, %v1620_v28  ;;  %v2465_v10 = vld [vmem:[%s2354_s11 + $0x50] sm:$0xff]  }
  0x37   : > { %v2407_v29 = vmul.f32 0.25, %v737_v20  ;;  %v2417_v33 = vmul.f32 0.25, %v736_v25  ;;  %v770_v44 = vadd.f32 %v1732_v23, %v762_v35  ;;  %v1717_v51 = vunpack.c.h.bf16 %v2387_v7  ;;  %v2476_v15 = vld [vmem:[%s2354_s11 + $0x70] sm:$0xff]  }
  0x38   : > { %v769_v30 = vadd.f32 %v1729_v4, %v761_v21  ;;  %v768_v34 = vadd.f32 %v1728_v12, %v760_v26  ;;  %v730_v50 = vadd.f32 %v1652_v32, %v722_v39  ;;  %v1733_v55 = vunpack.c.h.bf16 %v2390_v8  ;;  %v1743_v4 = vld [vmem:[%s2354_s11 + $0x10] sm:$0xff]  }
  0x39   : > { %v785_v38 = vmul.f32 %v2407_v29, %v2407_v29  ;;  %v784_v42 = vmul.f32 %v2417_v33, %v2417_v33  ;;  %v2441_v54 = vmul.f32 0.25, %v770_v44  ;;  %v755_v59 = vadd.f32 %v1701_v45, %v1685_v41  ;;  %v1759_v44 = vld [vmem:[%s2368_s12 + $0x18] sm:$0xff]  }
  0x3a   : > { %v2428_v40 = vmul.f32 0.25, %v769_v30  ;;  %v2432_v43 = vmul.f32 0.25, %v768_v34  ;;  %v738_v58 = vadd.f32 %v1668_v37, %v730_v50  ;;  %v1621_v60 = vunpack.c.h.bf16 %v2393_v13  ;;  %v1763_v45 = vld [vmem:[%s2368_s12 + $0x38] sm:$0xff]  }
  0x3b   : > { %v796_v48 = vsel %vm792_vm0, %v785_v38, 0.0  ;;  %v793_v52 = vsel %vm792_vm0, %v784_v42, 0.0  ;;  %v843_v0 = vmul.f32 %v2441_v54, %v2441_v54  ;;  %v1637_v1 = vunpack.c.h.bf16 %v2396_v18 }
  0x3c   : > { %v842_v49 = vmul.f32 %v2428_v40, %v2428_v40  ;;  %797 = vadd.xlane.f32.xlu1 %v796_v48  ;;  %v841_v53 = vmul.f32 %v2432_v43, %v2432_v43  ;;  %794 = vadd.xlane.f32.xlu0 %v793_v52  ;;  %v1653_v2 = vunpack.c.h.bf16 %v2399_v19  ;;  %v2460_v5 = vmul.f32 0.25, %v738_v58  ;;  %v2501_v48 = vld [vmem:[%s2368_s12 + $0x58] sm:$0xff]  }
  0x3d   : > { %v763_v6 = vadd.f32 %v1717_v51, %v755_v59  ;;  %v1669_v7 = vunpack.c.h.bf16 %v2404_v24  ;;  %v1688_v8 = vunpack.c.l.bf16 %v1758_v56  ;;  %1925 = vmatpush3.bf16.xpose.msk.msra.mxu0 %vm2333_vm1, %v2363_v46  ;;  %1973 = vmatpush3.bf16.xpose.msk.msra.mxu1 %vm2333_vm1, %v2363_v46  ;;  %v855_v11 = vsel %vm792_vm0, %v843_v0, 0.0  ;;  %v2517_v58 = vld [vmem:[%s2368_s12 + $0x78] sm:$0xff]  }
  0x3e   : > { %v852_v57 = vsel %vm792_vm0, %v842_v49, 0.0  ;;  %v849_v63 = vsel %vm792_vm0, %v841_v53, 0.0  ;;  %v723_v12 = vadd.f32 %v1637_v1, %v1621_v60  ;;  %v1704_v13 = vunpack.c.l.bf16 %v1762_v61  ;;  %1928 = vmatprep.subr.msk.bf16.mxu0 %vm2333_vm1, %v2365_v47  ;;  %1976 = vmatprep.subr.msk.bf16.mxu1 %vm2333_vm1, %v2365_v47  ;;  %v1744_v59 = vld [vmem:[%s2354_s11 + $0x18] sm:$0xff]  }
  0x3f   : > { %v1720_v14 = vunpack.c.l.bf16 %v2449_v62  ;;  %v786_v16 = vmul.f32 %v2460_v5, %v2460_v5  ;;  %v771_v17 = vadd.f32 %v1733_v55, %v763_v6  ;;  %v1736_v46 = vunpack.c.l.bf16 %v2457_v3  ;;  %v1748_v0 = vld [vmem:[%s2354_s11 + $0x38] sm:$0xff]  }
  0x40   : > { %853 = vadd.xlane.f32.xlu1 %v852_v57  ;;  %850 = vadd.xlane.f32.xlu0 %v849_v63  ;;  %v1624_v18 = vunpack.c.l.bf16 %v1743_v4  ;;  %v731_v19 = vadd.f32 %v1653_v2, %v723_v12  ;;  %v756_v20 = vadd.f32 %v1704_v13, %v1688_v8  ;;  %v1640_v21 = vunpack.c.l.bf16 %v1747_v9  ;;  %v1756_v6 = vld [vmem:[%s2354_s11 + $0x78] sm:$0xff]  }
  0x41   : > { %v1656_v22 = vunpack.c.l.bf16 %v2465_v10  ;;  %v799_v23 = vsel %vm792_vm0, %v786_v16, 0.0  ;;  %v2489_v24 = vmul.f32 0.25, %v771_v17  ;;  %v1672_v25 = vunpack.c.l.bf16 %v2476_v15 }
  0x42   : > { %v1689_v26 = vunpack.c.h.bf16 %v1758_v56  ;;  %v739_v27 = vadd.f32 %v1669_v7, %v731_v19  ;;  %v764_v28 = vadd.f32 %v1720_v14, %v756_v20  ;;  %v724_v30 = vadd.f32 %v1640_v21, %v1624_v18 }
  0x43   : > { %v1705_v31 = vunpack.c.h.bf16 %v1762_v61  ;;  %v844_v32 = vmul.f32 %v2489_v24, %v2489_v24  ;;  %v1721_v34 = vunpack.c.h.bf16 %v2449_v62  ;;  %v1737_v35 = vunpack.c.h.bf16 %v2457_v3 }
  0x44   : > { %856 = vadd.xlane.f32.xlu1 %v855_v11  ;;  %800 = vadd.xlane.f32.xlu0 %v799_v23  ;;  %v1625_v37 = vunpack.c.h.bf16 %v1743_v4  ;;  %v2496_v38 = vmul.f32 0.25, %v739_v27  ;;  %v772_v39 = vadd.f32 %v1736_v46, %v764_v28  ;;  %v732_v41 = vadd.f32 %v1656_v22, %v724_v30  ;;  %v1752_v4 = vld [vmem:[%s2354_s11 + $0x58] sm:$0xff]   ;;  %v710_v27 = vld [vmem:[%s2865_s2 + $0x40] sm:$0xff]  ;;  %v711_v28 = vld [vmem:[%s2865_s2 + $0x48] sm:$0xff] }
  0x45   : > { %v757_v42 = vadd.f32 %v1705_v31, %v1689_v26  ;;  %v858_v49 = vsel %vm792_vm0, %v844_v32, 0.0  ;;  %v1641_v50 = vunpack.c.h.bf16 %v1747_v9  ;;  %v1657_v51 = vunpack.c.h.bf16 %v2465_v10  ;;  %1931 = vmatpush3.bf16.xpose.msk.msra.mxu0 %vm2333_vm1, %v2365_v47  ;;  %1979 = vmatpush3.bf16.xpose.msk.msra.mxu1 %vm2333_vm1, %v2365_v47 }
  0x46   : > { %v1673_v52 = vunpack.c.h.bf16 %v2476_v15  ;;  %v787_v53 = vmul.f32 %v2496_v38, %v2496_v38  ;;  %v2514_v55 = vmul.f32 0.25, %v772_v39  ;;  %v740_v56 = vadd.f32 %v1672_v25, %v732_v41 }
  0x47   : > { %v765_v57 = vadd.f32 %v1721_v34, %v757_v42  ;;  %v725_v60 = vadd.f32 %v1641_v50, %v1625_v37  ;;  %v1692_v61 = vunpack.c.l.bf16 %v1759_v44  ;;  %v1708_v62 = vunpack.c.l.bf16 %v1763_v45  ;;  %v712_v42 = vld [vmem:[%s2865_s2 + $0x50] sm:$0xff] }
  0x48   : > { %859 = vadd.xlane.f32.xlu1 %v858_v49  ;;  %v1724_v63 = vunpack.c.l.bf16 %v2501_v48  ;;  %v802_v47 = vsel %vm792_vm0, %v787_v53, 0.0  ;;  %v845_v1 = vmul.f32 %v2514_v55, %v2514_v55  ;;  %v2525_v2 = vmul.f32 0.25, %v740_v56 }
  0x49   : > { %v773_v3 = vadd.f32 %v1737_v35, %v765_v57  ;;  %803 = vadd.xlane.f32.xlu0 %v802_v47  ;;  %v733_v7 = vadd.f32 %v1657_v51, %v725_v60  ;;  %v1740_v8 = vunpack.c.l.bf16 %v2517_v58  ;;  %v758_v9 = vadd.f32 %v1708_v62, %v1692_v61 }
  0x4a   : > { %v1628_v10 = vunpack.c.l.bf16 %v1744_v59  ;;  %v861_v11 = vsel %vm792_vm0, %v845_v1, 0.0  ;;  %v788_v12 = vmul.f32 %v2525_v2, %v2525_v2  ;;  %v1644_v14 = vunpack.c.l.bf16 %v1748_v0  ;;  %v714_v1 = vld [vmem:[%s2865_s2 + $0x60] sm:$0xff] }
  0x4b   : > { %v2533_v13 = vmul.f32 0.25, %v773_v3  ;;  %v741_v15 = vadd.f32 %v1673_v52, %v733_v7  ;;  %v766_v16 = vadd.f32 %v1724_v63, %v758_v9  ;;  %v1660_v17 = vunpack.c.l.bf16 %v1752_v4  ;;  %v715_v3 = vld [vmem:[%s2865_s2 + $0x68] sm:$0xff] }
  0x4c   : > { %862 = vadd.xlane.f32.xlu1 %v861_v11  ;;  %v1676_v46 = vunpack.c.l.bf16 %v1756_v6  ;;  %v805_v18 = vsel %vm792_vm0, %v788_v12, 0.0  ;;  %v726_v20 = vadd.f32 %v1644_v14, %v1628_v10  ;;  %v1693_v21 = vunpack.c.h.bf16 %v1759_v44  ;;  %v713_v44 = vld [vmem:[%s2865_s2 + $0x58] sm:$0xff]  ;;  %v716_v11 = vld [vmem:[%s2865_s2 + $0x70] sm:$0xff] }
  0x4d   : > { %v846_v19 = vmul.f32 %v2533_v13, %v2533_v13  ;;  %806 = vadd.xlane.f32.xlu0 %v805_v18  ;;  %v2538_v22 = vmul.f32 0.25, %v741_v15  ;;  %v774_v23 = vadd.f32 %v1740_v8, %v766_v16  ;;  %v1709_v25 = vunpack.c.h.bf16 %v1763_v45  ;;  %v717_v12 = vld [vmem:[%s2865_s2 + $0x78] sm:$0xff] }
  0x4e   : > { %v1725_v26 = vunpack.c.h.bf16 %v2501_v48  ;;  %v734_v31 = vadd.f32 %v1660_v17, %v726_v20  ;;  %v1741_v32 = vunpack.c.h.bf16 %v2517_v58  ;;  %v1629_v34 = vunpack.c.h.bf16 %v1744_v59 }
  0x4f   : > { %v864_v30 = vsel %vm792_vm0, %v846_v19, 0.0  ;;  %v789_v35 = vmul.f32 %v2538_v22, %v2538_v22  ;;  %v2551_v37 = vmul.f32 0.25, %v774_v23  ;;  %v759_v39 = vadd.f32 %v1709_v25, %v1693_v21 }
  0x50   : > { %865 = vadd.xlane.f32.xlu1 %v864_v30  ;;  %v1645_v41 = vunpack.c.h.bf16 %v1748_v0  ;;  %v742_v45 = vadd.f32 %v1676_v46, %v734_v31  ;;  %v1661_v48 = vunpack.c.h.bf16 %v1752_v4  ;;  %v1677_v49 = vunpack.c.h.bf16 %v1756_v6 }
  0x51   : > { %v1932_v50 = vpack.c.bf16 %v711_v28, %v710_v27  ;;  %v808_v51 = vsel %vm792_vm0, %v789_v35, 0.0  ;;  %v847_v52 = vmul.f32 %v2551_v37, %v2551_v37  ;;  %v767_v53 = vadd.f32 %v1725_v26, %v759_v39 }
  0x52   : > { %v727_v56 = vadd.f32 %v1645_v41, %v1629_v34  ;;  %809 = vadd.xlane.f32.xlu0 %v808_v51  ;;  %v2562_v57 = vmul.f32 0.25, %v742_v45  ;;  %v1938_v58 = vpack.c.bf16 %v713_v44, %v712_v42  ;;  %v1944_v9 = vpack.c.bf16 %v715_v3, %v714_v1 }
  0x53   : > { %1934 = vmatprep.subr.msk.bf16.mxu0 %vm2333_vm1, %v1932_v50  ;;  %v867_v59 = vsel %vm792_vm0, %v847_v52, 0.0  ;;  %v775_v60 = vadd.f32 %v1741_v32, %v767_v53  ;;  %1982 = vmatprep.subr.msk.bf16.mxu1 %vm2333_vm1, %v1932_v50  ;;  %v1950_v14 = vpack.c.bf16 %v717_v12, %v716_v11 }
  0x54   : > { %v735_v61 = vadd.f32 %v1661_v48, %v727_v56  ;;  %1937 = vmatpush3.bf16.xpose.msk.msra.mxu0 %vm2333_vm1, %v1932_v50  ;;  %868 = vadd.xlane.f32.xlu1 %v867_v59  ;;  %v790_v62 = vmul.f32 %v2562_v57, %v2562_v57 }
  0x55   : > { %1985 = vmatpush3.bf16.xpose.msk.msra.mxu1 %vm2333_vm1, %v1932_v50  ;;  %v2575_v63 = vmul.f32 0.25, %v775_v60  ;;  %1940 = vmatprep.subr.msk.bf16.mxu0 %vm2333_vm1, %v1938_v58 }
  0x56   : > { %v743_v0 = vadd.f32 %v1677_v49, %v735_v61  ;;  %1988 = vmatprep.subr.msk.bf16.mxu1 %vm2333_vm1, %v1938_v58  ;;  %v811_v47 = vsel %vm792_vm0, %v790_v62, 0.0 }
  0x57   : > { %812 = vadd.xlane.f32.xlu0 %v811_v47  ;;  %v848_v4 = vmul.f32 %v2575_v63, %v2575_v63 }
  0x58   : > { %v2590_v6 = vmul.f32 0.25, %v743_v0 }
  0x59   : > { %v870_v7 = vsel %vm792_vm0, %v848_v4, 0.0 }
  0x5a   : > { %v791_v8 = vmul.f32 %v2590_v6, %v2590_v6  ;;  %871 = vadd.xlane.f32.xlu1 %v870_v7 }
  0x5c   : > { %v814_v10 = vsel %vm792_vm0, %v791_v8, 0.0  ;;  %1943 = vmatpush3.bf16.xpose.msk.msra.mxu0 %vm2333_vm1, %v1938_v58 }
  0x5d   : > { %815 = vadd.xlane.f32.xlu0 %v814_v10  ;;  %1991 = vmatpush3.bf16.xpose.msk.msra.mxu1 %vm2333_vm1, %v1938_v58 }
  0x5e   : > { %1946 = vmatprep.subr.msk.bf16.mxu0 %vm2333_vm1, %v1944_v9  ;;  %1994 = vmatprep.subr.msk.bf16.mxu1 %vm2333_vm1, %v1944_v9 }
  0x64   : > { %1949 = vmatpush3.bf16.xpose.msk.msra.mxu0 %vm2333_vm1, %v1944_v9 }
  0x65   : > { %1997 = vmatpush3.bf16.xpose.msk.msra.mxu1 %vm2333_vm1, %v1944_v9  ;;  %1952 = vmatprep.subr.msk.bf16.mxu0 %vm2333_vm1, %v1950_v14 }
  0x66   : > { %2000 = vmatprep.subr.msk.bf16.mxu1 %vm2333_vm1, %v1950_v14 }
  0x6c   : > { %1955 = vmatpush3.bf16.xpose.msk.msra.mxu0 %vm2333_vm1, %v1950_v14 }
  0x6d   : > { %2003 = vmatpush3.bf16.xpose.msk.msra.mxu1 %vm2333_vm1, %v1950_v14 }
  0xc9   : > { %v798_v15 = vpop.xlane.xlu1 %797  ;;  %v795_v17 = vpop.xlane.xlu0 %794 }
  0xca   : > { %v818_v16 = vmax.f32 %v798_v15, 1e-24  ;;  %v817_v46 = vmax.f32 %v795_v17, 1e-24 }
  0xcc   : > { %2048 = vrsqrt.f32 %v818_v16 }
  0xcd   : > { %2050 = vrsqrt.f32 %v817_v46  ;;  %v854_v18 = vpop.xlane.xlu1 %853  ;;  %v851_v20 = vpop.xlane.xlu0 %850 }
  0xce   : > { %v874_v19 = vmax.f32 %v854_v18, 1e-24  ;;  %v873_v21 = vmax.f32 %v851_v20, 1e-24  ;;  %v2200_v20 = vmov 0  }
  0xd0   : > { %2052 = vrsqrt.f32 %v874_v19 }
  0xd1   : > { %2054 = vrsqrt.f32 %v873_v21  ;;  %v857_v23 = vpop.xlane.xlu1 %856  ;;  %v801_v26 = vpop.xlane.xlu0 %800 }
  0xd2   : > { %v875_v25 = vmax.f32 %v857_v23, 1e-24  ;;  %v819_v27 = vmax.f32 %v801_v26, 1e-24 }
  0xd4   : > { %2056 = vrsqrt.f32 %v875_v25 }
  0xd5   : > { %2058 = vrsqrt.f32 %v819_v27  ;;  %v860_v36 = vpop.xlane.xlu1 %859 }
  0xd6   : > { %v2049_v28 = vpop.eup %2048  ;;  %v876_v30 = vmax.f32 %v860_v36, 1e-24  ;;  %v804_v34 = vpop.xlane.xlu0 %803 }
  0xd7   : > { %v2051_v31 = vpop.eup %2050  ;;  %v834_v32 = vmul.f32 %v2049_v28, %v2407_v29  ;;  %v820_v39 = vmax.f32 %v804_v34, 1e-24 }
  0xd8   : > { %2060 = vrsqrt.f32 %v876_v30  ;;  %v833_v35 = vmul.f32 %v2051_v31, %v2417_v33 }
  0xd9   : > { %v863_v42 = vpop.xlane.xlu1 %862  ;;  %2062 = vrsqrt.f32 %v820_v39 }
  0xda   : > { %v2053_v41 = vpop.eup %2052  ;;  %1852 = vmatprep.mubr.msk.f32.mxu0 %vm792_vm0, %v833_v35  ;;  %v877_v45 = vmax.f32 %v863_v42, 1e-24  ;;  %v807_v49 = vpop.xlane.xlu0 %806 }
  0xdb   : > { %v2055_v44 = vpop.eup %2054  ;;  %1853 = vmatmul.mubr.msk.f32.vlgmr.msra.gmra.mrb[0].mxu0 %vm792_vm0, %v834_v32  ;;  %v890_v48 = vmul.f32 %v2053_v41, %v2428_v40  ;;  %v821_v29 = vmax.f32 %v807_v49, 1e-24 }
  0xdc   : > { %v889_v50 = vmul.f32 %v2055_v44, %v2432_v43  ;;  %2064 = vrsqrt.f32 %v877_v45 }
  0xdd   : > { %v866_v52 = vpop.xlane.xlu1 %865  ;;  %2066 = vrsqrt.f32 %v821_v29 }
  0xde   : > { %v2057_v51 = vpop.eup %2056  ;;  %1896 = vmatprep.mubr.msk.f32.mxu1 %vm792_vm0, %v889_v50  ;;  %v878_v53 = vmax.f32 %v866_v52, 1e-24 }
  0xdf   : > { %v2059_v33 = vpop.eup %2058  ;;  %1897 = vmatmul.mubr.msk.f32.vlgmr.msra.gmra.mrb[0].mxu1 %vm792_vm0, %v890_v48  ;;  %v891_v56 = vmul.f32 %v2057_v51, %v2441_v54  ;;  %v810_v40 = vpop.xlane.xlu0 %809 }
  0xe0   : > { %v835_v58 = vmul.f32 %v2059_v33, %v2460_v5  ;;  %2068 = vrsqrt.f32 %v878_v53  ;;  %v822_v59 = vmax.f32 %v810_v40, 1e-24 }
  0xe1   : > { %1899 = vmatprep.mubr.msk.f32.mxu1 %vm792_vm0, %v891_v56  ;;  %v869_v60 = vpop.xlane.xlu1 %868 }
  0xe2   : > { %v2061_v43 = vpop.eup %2060  ;;  %1855 = vmatprep.mubr.msk.f32.mxu0 %vm792_vm0, %v835_v58  ;;  %2070 = vrsqrt.f32 %v822_v59  ;;  %v879_v62 = vmax.f32 %v869_v60, 1e-24 }
  0xe3   : > { %v892_v61 = vmul.f32 %v2061_v43, %v2489_v24  ;;  %v2063_v0 = vpop.eup %2062 }
  0xe4   : > { %2072 = vrsqrt.f32 %v879_v62  ;;  %v813_v54 = vpop.xlane.xlu0 %812  ;;  %v836_v5 = vmul.f32 %v2063_v0, %v2496_v38 }
  0xe5   : > { %1900 = vmatmul.mubr.msk.f32.gmra.mrb[2].mxu1 %vm792_vm0, %v892_v61  ;;  %v823_v1 = vmax.f32 %v813_v54, 1e-24 }
  0xe6   : > { %v2065_v47 = vpop.eup %2064  ;;  %1856 = vmatmul.mubr.msk.f32.gmra.mrb[2].mxu0 %vm792_vm0, %v836_v5 }
  0xe7   : > { %v893_v3 = vmul.f32 %v2065_v47, %v2514_v55  ;;  %v2067_v4 = vpop.eup %2066  ;;  %2074 = vrsqrt.f32 %v823_v1  ;;  %v872_v7 = vpop.xlane.xlu1 %871 }
  0xe8   : > { %v880_v8 = vmax.f32 %v872_v7, 1e-24  ;;  %v837_v24 = vmul.f32 %v2067_v4, %v2525_v2 }
  0xe9   : > { %1902 = vmatprep.mubr.msk.f32.mxu1 %vm792_vm0, %v893_v3 }
  0xea   : > { %v2069_v9 = vpop.eup %2068  ;;  %v816_v10 = vpop.xlane.xlu0 %815  ;;  %2076 = vrsqrt.f32 %v880_v8  ;;  %1858 = vmatprep.mubr.msk.f32.mxu0 %vm792_vm0, %v837_v24 }
  0xeb   : > { %v824_v11 = vmax.f32 %v816_v10, 1e-24  ;;  %v894_v38 = vmul.f32 %v2069_v9, %v2533_v13 }
  0xec   : > { %v2071_v12 = vpop.eup %2070 }
  0xed   : > { %2078 = vrsqrt.f32 %v824_v11  ;;  %1903 = vmatmul.mubr.msk.f32.gmra.mrb[4].mxu1 %vm792_vm0, %v894_v38  ;;  %v838_v55 = vmul.f32 %v2071_v12, %v2538_v22  ;;  %v1220_v22 = vlaneseq }
  0xee   : > { %v2073_v14 = vpop.eup %2072 }
  0xef   : > { %1859 = vmatmul.mubr.msk.f32.gmra.mrb[4].mxu0 %vm792_vm0, %v838_v55  ;;  %v895_v2 = vmul.f32 %v2073_v14, %v2551_v37  ;;  %v718_v37 = vld [vmem:[%s2866_s3] sm:$0x1]  ;;  %v1221_v19 = vshrl.u32 %v1220_v22, 7 }
  0xf0   : > { %vm719_vm2 = vcmp.gt.f32.partialorder %v718_v37, 0.0 }
  0xf1   : > { %v2075_v15 = vpop.eup %2074  ;;  %1905 = vmatprep.mubr.msk.f32.mxu1 %vm792_vm0, %v895_v2  ;;  %v1219_v21 = vsel %vm719_vm2, 1, %v2200_v20 }
  0xf2   : > { %v839_v16 = vmul.f32 %v2075_v15, %v2562_v57  ;;  %v1222_v57 = vsub.s32 0, %v1221_v19 }
  0xf4   : > { %v2077_v17 = vpop.eup %2076  ;;  %1861 = vmatprep.mubr.msk.f32.mxu0 %vm792_vm0, %v839_v16  ;;  %v2657_v23 = vrot.slane %v1219_v21, %v1222_v57 }
  0xf5   : > { %v896_v13 = vmul.f32 %v2077_v17, %v2575_v63 }
  0xf6   : > { %vm1224_vm3 = vcmp.eq.s32.totalorder %v2657_v23, 1 }
  0xf7   : > { %v2079_v46 = vpop.eup %2078  ;;  %1906 = vmatmul.mubr.msk.f32.gmra.mrb[6].mxu1 %vm792_vm0, %v896_v13 }
  0xf8   : > { %v840_v18 = vmul.f32 %v2079_v46, %v2590_v6 }
  0xfa   : > { %1862 = vmatmul.mubr.msk.f32.gmra.mrb[6].mxu0 %vm792_vm0, %v840_v18 }
 0x1ae   : > { %v1854_v63 = vpop.f32.mrb[0].mxu0 }
 0x1af   : > { %v1075_v6 = vmul.f32 10.0, %v1854_v63  ;;  %v1035_v25 = vpop.f32.mrb[1].mxu0 }
 0x1b0   : > { %v1074_v26 = vmul.f32 10.0, %v1035_v25 }
 0x1b1   : > { %v1226_v27 = vsel %vm1224_vm3, %v1075_v6, -1e+30 }
 0x1b2   : > { %1243 = vmax.xlane.f32.xlu1 %v1226_v27  ;;  %v1898_v36 = vpop.f32.mrb[0].mxu1  ;;  %v1225_v28 = vsel %vm1224_vm3, %v1074_v26, -1e+30 }
 0x1b3   : > { %v1212_v30 = vmul.f32 10.0, %v1898_v36  ;;  %1241 = vmax.xlane.f32.xlu0 %v1225_v28  ;;  %v1172_v31 = vpop.f32.mrb[1].mxu1 }
 0x1b4   : > { %v1211_v32 = vmul.f32 10.0, %v1172_v31 }
 0x1b5   : > { %v1234_v34 = vsel %vm1224_vm3, %v1212_v30, -1e+30 }
 0x1b6   : > { %1323 = vmax.xlane.f32.xlu1 %v1234_v34  ;;  %v1233_v35 = vsel %vm1224_vm3, %v1211_v32, -1e+30 }
 0x1b7   : > { %1321 = vmax.xlane.f32.xlu0 %v1233_v35 }
 0x1b8   : > { %v1901_v39 = vpop.f32.mrb[2].mxu1 }
 0x1b9   : > { %v1214_v41 = vmul.f32 10.0, %v1901_v39  ;;  %v1182_v42 = vpop.f32.mrb[3].mxu1  ;;  %v1857_v44 = vpop.f32.mrb[2].mxu0 }
 0x1ba   : > { %v1213_v45 = vmul.f32 10.0, %v1182_v42  ;;  %v1077_v49 = vmul.f32 10.0, %v1857_v44  ;;  %v1045_v50 = vpop.f32.mrb[3].mxu0 }
 0x1bb   : > { %v1236_v48 = vsel %vm1224_vm3, %v1214_v41, -1e+30  ;;  %v1076_v29 = vmul.f32 10.0, %v1045_v50 }
 0x1bc   : > { %1327 = vmax.xlane.f32.xlu1 %v1236_v48  ;;  %v1228_v51 = vsel %vm1224_vm3, %v1077_v49, -1e+30  ;;  %v1235_v52 = vsel %vm1224_vm3, %v1213_v45, -1e+30 }
 0x1bd   : > { %1247 = vmax.xlane.f32.xlu0 %v1228_v51  ;;  %v2676_v56 = vsel %vm1224_vm3, %v1076_v29, -1e+30 }
 0x1c0   : > { %1325 = vmax.xlane.f32.xlu1 %v1235_v52  ;;  %v1904_v33 = vpop.f32.mrb[4].mxu1 }
 0x1c1   : > { %v1216_v53 = vmul.f32 10.0, %v1904_v33  ;;  %v1192_v58 = vpop.f32.mrb[5].mxu1  ;;  %1245 = vmax.xlane.f32.xlu0 %v2676_v56 }
 0x1c2   : > { %v1860_v40 = vpop.f32.mrb[4].mxu0  ;;  %v1215_v43 = vmul.f32 10.0, %v1192_v58 }
 0x1c3   : > { %v2681_v59 = vsel %vm1224_vm3, %v1216_v53, -1e+30  ;;  %v1079_v60 = vmul.f32 10.0, %v1860_v40  ;;  %v1055_v61 = vpop.f32.mrb[5].mxu0 }
 0x1c4   : > { %1331 = vmax.xlane.f32.xlu1 %v2681_v59  ;;  %v1078_v62 = vmul.f32 10.0, %v1055_v61  ;;  %v2691_v54 = vsel %vm1224_vm3, %v1215_v43, -1e+30 }
 0x1c5   : > { %v2686_v0 = vsel %vm1224_vm3, %v1079_v60, -1e+30 }
 0x1c6   : > { %1251 = vmax.xlane.f32.xlu0 %v2686_v0  ;;  %v2696_v5 = vsel %vm1224_vm3, %v1078_v62, -1e+30 }
 0x1c8   : > { %1329 = vmax.xlane.f32.xlu1 %v2691_v54 }
 0x1ca   : > { %v1907_v47 = vpop.f32.mrb[6].mxu1  ;;  %1249 = vmax.xlane.f32.xlu0 %v2696_v5 }
 0x1cb   : > { %v1202_v1 = vpop.f32.mrb[7].mxu1  ;;  %v1218_v8 = vmul.f32 10.0, %v1907_v47 }
 0x1cc   : > { %v1217_v4 = vmul.f32 10.0, %v1202_v1 }
 0x1cd   : > { %v1863_v3 = vpop.f32.mrb[6].mxu0  ;;  %v2711_v38 = vsel %vm1224_vm3, %v1218_v8, -1e+30 }
 0x1ce   : > { %v1065_v7 = vpop.f32.mrb[7].mxu0  ;;  %v2701_v9 = vsel %vm1224_vm3, %v1217_v4, -1e+30  ;;  %v1081_v10 = vmul.f32 10.0, %v1863_v3 }
 0x1cf   : > { %v1080_v24 = vmul.f32 10.0, %v1065_v7  ;;  %1333 = vmax.xlane.f32.xlu1 %v2701_v9 }
 0x1d0   : > { %v2716_v12 = vsel %vm1224_vm3, %v1081_v10, -1e+30 }
 0x1d1   : > { %v2706_v11 = vsel %vm1224_vm3, %v1080_v24, -1e+30 }
 0x1d2   : > { %1253 = vmax.xlane.f32.xlu0 %v2706_v11 }
 0x1d3   : > { %1335 = vmax.xlane.f32.xlu1 %v2711_v38 }
 0x1d6   : > { %1255 = vmax.xlane.f32.xlu0 %v2716_v12 }
 0x23f   : > { %v1244_v55 = vpop.xlane.xlu1 %1243 }
 0x240   : > { %v2719_v14 = vsub.f32 %v1226_v27, %v1244_v55  ;;  %v1242_v2 = vpop.xlane.xlu0 %1241 }
 0x241   : > { %v2721_v15 = vsub.f32 %v1225_v28, %v1242_v2 }
 0x242   : > { %v1267_v16 = vmul.f32 1.442695, %v2719_v14 }
 0x243   : > { %v1265_v17 = vmul.f32 1.442695, %v2721_v15  ;;  %v1324_v13 = vpop.xlane.xlu1 %1323 }
 0x244   : > { %2080 = vpow2.f32 %v1267_v16  ;;  %v2725_v46 = vsub.f32 %v1234_v34, %v1324_v13  ;;  %v1322_v18 = vpop.xlane.xlu0 %1321 }
 0x245   : > { %2082 = vpow2.f32 %v1265_v17  ;;  %v2727_v22 = vsub.f32 %v1233_v35, %v1322_v18 }
 0x246   : > { %v1347_v37 = vmul.f32 1.442695, %v2725_v46 }
 0x247   : > { %v1345_v19 = vmul.f32 1.442695, %v2727_v22 }
 0x248   : > { %2084 = vpow2.f32 %v1347_v37 }
 0x249   : > { %2086 = vpow2.f32 %v1345_v19  ;;  %v1328_v57 = vpop.xlane.xlu1 %1327 }
 0x24a   : > { %v2731_v20 = vsub.f32 %v1236_v48, %v1328_v57  ;;  %v1248_v63 = vpop.xlane.xlu0 %1247 }
 0x24b   : > { %v2734_v6 = vsub.f32 %v1228_v51, %v1248_v63 }
 0x24c   : > { %v1351_v21 = vmul.f32 1.442695, %v2731_v20 }
 0x24d   : > { %v1326_v25 = vpop.xlane.xlu1 %1325  ;;  %v1271_v28 = vmul.f32 1.442695, %v2734_v6 }
 0x24e   : > { %v2081_v26 = vpop.eup %2080  ;;  %2088 = vpow2.f32 %v1351_v21  ;;  %v2736_v27 = vsub.f32 %v1235_v52, %v1326_v25  ;;  %v1246_v31 = vpop.xlane.xlu0 %1245 }
 0x24f   : > { %v2083_v36 = vpop.eup %2082  ;;  %1283 = vadd.xlane.f32.xlu1 %v2081_v26  ;;  %2090 = vpow2.f32 %v1271_v28  ;;  %v2741_v32 = vsub.f32 %v2676_v56, %v1246_v31 }
 0x250   : > { %v1349_v30 = vmul.f32 1.442695, %v2736_v27  ;;  %1281 = vadd.xlane.f32.xlu0 %v2083_v36 }
 0x251   : > { %v1332_v35 = vpop.xlane.xlu1 %1331  ;;  %v1269_v41 = vmul.f32 1.442695, %v2741_v32 }
 0x252   : > { %v2743_v34 = vpop.eup %2084  ;;  %2092 = vpow2.f32 %v1349_v30  ;;  %v2749_v42 = vsub.f32 %v2681_v59, %v1332_v35 }
 0x253   : > { %v2745_v39 = vpop.eup %2086  ;;  %1363 = vadd.xlane.f32.xlu1 %v2743_v34  ;;  %2094 = vpow2.f32 %v1269_v41  ;;  %v1252_v45 = vpop.xlane.xlu0 %1251 }
 0x254   : > { %1361 = vadd.xlane.f32.xlu0 %v2745_v39  ;;  %v1355_v44 = vmul.f32 1.442695, %v2749_v42  ;;  %v2755_v48 = vsub.f32 %v2686_v0, %v1252_v45 }
 0x255   : > { %v1330_v49 = vpop.xlane.xlu1 %1329 }
 0x256   : > { %2096 = vpow2.f32 %v1355_v44  ;;  %v2758_v50 = vsub.f32 %v2691_v54, %v1330_v49  ;;  %v1275_v51 = vmul.f32 1.442695, %v2755_v48 }
 0x257   : > { %v1250_v33 = vpop.xlane.xlu0 %1249 }
 0x258   : > { %v2760_v29 = vpop.eup %2088  ;;  %v1353_v52 = vmul.f32 1.442695, %v2758_v50  ;;  %2098 = vpow2.f32 %v1275_v51  ;;  %v2766_v53 = vsub.f32 %v2696_v5, %v1250_v33 }
 0x259   : > { %1367 = vadd.xlane.f32.xlu1 %v2760_v29  ;;  %v2091_v56 = vpop.eup %2090 }
 0x25a   : > { %2100 = vpow2.f32 %v1353_v52  ;;  %v1273_v40 = vmul.f32 1.442695, %v2766_v53  ;;  %1287 = vadd.xlane.f32.xlu0 %v2091_v56 }
 0x25c   : > { %v2768_v58 = vpop.eup %2092  ;;  %2102 = vpow2.f32 %v1273_v40  ;;  %v1334_v43 = vpop.xlane.xlu1 %1333 }
 0x25d   : > { %1365 = vadd.xlane.f32.xlu1 %v2768_v58  ;;  %v2095_v59 = vpop.eup %2094  ;;  %v2773_v60 = vsub.f32 %v2701_v9, %v1334_v43 }
 0x25e   : > { %1285 = vadd.xlane.f32.xlu0 %v2095_v59 }
 0x25f   : > { %v1254_v61 = vpop.xlane.xlu0 %1253  ;;  %v1357_v0 = vmul.f32 1.442695, %v2773_v60 }
 0x260   : > { %v2775_v62 = vpop.eup %2096  ;;  %v2779_v54 = vsub.f32 %v2706_v11, %v1254_v61  ;;  %v1336_v5 = vpop.xlane.xlu1 %1335 }
 0x261   : > { %1371 = vadd.xlane.f32.xlu1 %v2775_v62  ;;  %2104 = vpow2.f32 %v1357_v0  ;;  %v2784_v1 = vsub.f32 %v2711_v38, %v1336_v5 }
 0x262   : > { %v1277_v47 = vmul.f32 1.442695, %v2779_v54  ;;  %v2099_v3 = vpop.eup %2098 }
 0x263   : > { %v1256_v4 = vpop.xlane.xlu0 %1255  ;;  %v1359_v8 = vmul.f32 1.442695, %v2784_v1  ;;  %1291 = vadd.xlane.f32.xlu0 %v2099_v3 }
 0x264   : > { %v2786_v7 = vpop.eup %2100  ;;  %2106 = vpow2.f32 %v1277_v47  ;;  %v2790_v24 = vsub.f32 %v2716_v12, %v1256_v4 }
 0x265   : > { %1369 = vadd.xlane.f32.xlu1 %v2786_v7  ;;  %2108 = vpow2.f32 %v1359_v8 }
 0x266   : > { %v1279_v9 = vmul.f32 1.442695, %v2790_v24  ;;  %v2103_v10 = vpop.eup %2102 }
 0x267   : > { %1289 = vadd.xlane.f32.xlu0 %v2103_v10 }
 0x268   : > { %2110 = vpow2.f32 %v1279_v9 }
 0x26b   : > { %v2794_v11 = vpop.eup %2104 }
 0x26c   : > { %1373 = vadd.xlane.f32.xlu1 %v2794_v11 }
 0x26e   : > { %v2107_v38 = vpop.eup %2106 }
 0x26f   : > { %1293 = vadd.xlane.f32.xlu0 %v2107_v38  ;;  %v2797_v55 = vpop.eup %2108 }
 0x270   : > { %1375 = vadd.xlane.f32.xlu1 %v2797_v55 }
 0x272   : > { %v2111_v12 = vpop.eup %2110 }
 0x273   : > { %1295 = vadd.xlane.f32.xlu0 %v2111_v12 }
 0x2dc   : > { %v1284_v2 = vpop.xlane.xlu1 %1283 }
 0x2dd   : > { %v1282_v16 = vpop.xlane.xlu0 %1281  ;;  %2112 = vlog2.f32 %v1284_v2 }
 0x2e0   : > { %v1364_v17 = vpop.xlane.xlu1 %1363 }
 0x2e1   : > { %v1362_v13 = vpop.xlane.xlu0 %1361  ;;  %2114 = vlog2.f32 %v1364_v17 }
 0x2e2   : > { %2116 = vlog2.f32 %v1362_v13 }
 0x2e3   : > { %2118 = vlog2.f32 %v1282_v16 }
 0x2e4   : > { %2120 = vrcp.f32 %v1364_v17 }
 0x2e6   : > { %v1368_v18 = vpop.xlane.xlu1 %1367 }
 0x2e7   : > { %v1288_v37 = vpop.xlane.xlu0 %1287  ;;  %2122 = vlog2.f32 %v1368_v18  ;;  %v2113_v57 = vpop.eup %2112 }
 0x2e8   : > { %2124 = vlog2.f32 %v1288_v37  ;;  %v1300_v31 = vmul.f32 0.6931472, %v2113_v57 }
 0x2ea   : > { %v1366_v19 = vpop.xlane.xlu1 %1365  ;;  %v1314_v40 = vsub.f32 %v2719_v14, %v1300_v31 }
 0x2eb   : > { %2126 = vlog2.f32 %v1366_v19  ;;  %v2115_v21 = vpop.eup %2114  ;;  %v1286_v63 = vpop.xlane.xlu0 %1285 }
 0x2ec   : > { %2128 = vrcp.f32 %v1362_v13  ;;  %v2117_v25 = vpop.eup %2116  ;;  %v1396_v28 = vmul.f32 0.6931472, %v2115_v21 }
 0x2ed   : > { %2130 = vlog2.f32 %v1286_v63  ;;  %v2119_v26 = vpop.eup %2118  ;;  %v1394_v30 = vmul.f32 0.6931472, %v2117_v25 }
 0x2ee   : > { %v1372_v36 = vpop.xlane.xlu1 %1371  ;;  %2132 = vrcp.f32 %v1366_v19  ;;  %v1298_v35 = vmul.f32 0.6931472, %v2119_v26  ;;  %v2121_v44 = vpop.eup %2120  ;;  %v1410_v51 = vsub.f32 %v2725_v46, %v1396_v28 }
 0x2ef   : > { %2134 = vlog2.f32 %v1372_v36  ;;  %v1409_v52 = vsub.f32 %v2727_v22, %v1394_v30  ;;  %v1386_v10 = vmul.f32 %v2121_v44, %v2743_v34 }
 0x2f0   : > { %v1292_v41 = vpop.xlane.xlu0 %1291  ;;  %v1313_v43 = vsub.f32 %v2721_v15, %v1298_v35  ;;  %v1418_v47 = vsub.f32 %v1410_v51, %v1314_v40 }
 0x2f1   : > { %2136 = vlog2.f32 %v1292_v41  ;;  %v2123_v49 = vpop.eup %2122 }
 0x2f2   : > { %v1370_v45 = vpop.xlane.xlu1 %1369  ;;  %v2125_v33 = vpop.eup %2124  ;;  %2138 = vrcp.f32 %v1368_v18  ;;  %v1417_v3 = vsub.f32 %v1409_v52, %v1313_v43  ;;  %v1400_v4 = vmul.f32 0.6931472, %v2123_v49  ;;  %v1426_v2 = vmul.f32 %v1418_v47, %v1386_v10 }
 0x2f3   : > { %2140 = vlog2.f32 %v1370_v45  ;;  %v1304_v8 = vmul.f32 0.6931472, %v2125_v33 }
 0x2f4   : > { %v1290_v59 = vpop.xlane.xlu0 %1289  ;;  %v1412_v17 = vsub.f32 %v2731_v20, %v1400_v4  ;;  %v1434_v25 = vsel %vm1224_vm3, %v1426_v2, 0.0 }
 0x2f5   : > { %v2127_v56 = vpop.eup %2126  ;;  %2142 = vlog2.f32 %v1290_v59  ;;  %v1316_v18 = vsub.f32 %v2734_v6, %v1304_v8 }
 0x2f6   : > { %v2129_v61 = vpop.eup %2128  ;;  %v1398_v0 = vmul.f32 0.6931472, %v2127_v56  ;;  %2144 = vrcp.f32 %v1370_v45 }
 0x2f7   : > { %v2131_v5 = vpop.eup %2130  ;;  %v1385_v14 = vmul.f32 %v2129_v61, %v2745_v39  ;;  %2146 = vrcp.f32 %v1372_v36  ;;  %v1420_v26 = vsub.f32 %v1412_v17, %v1316_v18 }
 0x2f8   : > { %v1411_v46 = vsub.f32 %v2736_v27, %v1398_v0  ;;  %v1302_v22 = vmul.f32 0.6931472, %v2131_v5  ;;  %v2133_v9 = vpop.eup %2132 }
 0x2f9   : > { %v1374_v38 = vpop.xlane.xlu1 %1373  ;;  %v2135_v12 = vpop.eup %2134  ;;  %v1425_v16 = vmul.f32 %v1417_v3, %v1385_v14  ;;  %v1387_v27 = vmul.f32 %v2133_v9, %v2768_v58 }
 0x2fa   : > { %v1315_v15 = vsub.f32 %v2741_v32, %v1302_v22  ;;  %2148 = vlog2.f32 %v1374_v38  ;;  %v1404_v57 = vmul.f32 0.6931472, %v2135_v12 }
 0x2fb   : > { %v2137_v13 = vpop.eup %2136  ;;  %v1433_v6 = vsel %vm1224_vm3, %v1425_v16, 0.0 }
 0x2fc   : > { %v1419_v37 = vsub.f32 %v1411_v46, %v1315_v15  ;;  %v1294_v19 = vpop.xlane.xlu0 %1293  ;;  %v2139_v34 = vpop.eup %2138  ;;  %v1308_v32 = vmul.f32 0.6931472, %v2137_v13  ;;  %v1414_v41 = vsub.f32 %v2749_v42, %v1404_v57  ;;  %v1442_v51 = vadd.f32 %v1434_v25, %v1433_v6 }
 0x2fd   : > { %2150 = vlog2.f32 %v1294_v19  ;;  %v1376_v21 = vpop.xlane.xlu1 %1375  ;;  %v2141_v63 = vpop.eup %2140  ;;  %v1388_v28 = vmul.f32 %v2139_v34, %v2760_v29 }
 0x2fe   : > { %v1427_v39 = vmul.f32 %v1419_v37, %v1387_v27  ;;  %2152 = vrcp.f32 %v1374_v38  ;;  %v1402_v58 = vmul.f32 0.6931472, %v2141_v63  ;;  %v1318_v44 = vsub.f32 %v2755_v48, %v1308_v32 }
 0x2ff   : > { %v2143_v20 = vpop.eup %2142  ;;  %2154 = vlog2.f32 %v1376_v21  ;;  %v1428_v52 = vmul.f32 %v1420_v26, %v1388_v28 }
 0x300   : > { %v1296_v36 = vpop.xlane.xlu0 %1295  ;;  %v1306_v30 = vmul.f32 0.6931472, %v2143_v20  ;;  %v2145_v31 = vpop.eup %2144  ;;  %v1435_v35 = vsel %vm1224_vm3, %v1427_v39, 0.0  ;;  %v1413_v45 = vsub.f32 %v2758_v50, %v1402_v58  ;;  %v1422_v59 = vsub.f32 %v1414_v41, %v1318_v44 }
 0x301   : > { %2156 = vlog2.f32 %v1296_v36  ;;  %v2147_v33 = vpop.eup %2146  ;;  %v1389_v29 = vmul.f32 %v2145_v31, %v2786_v7  ;;  %v1443_v40 = vadd.f32 %v1442_v51, %v1435_v35  ;;  %v1436_v50 = vsel %vm1224_vm3, %v1428_v52, 0.0 }
 0x302   : > { %v1317_v49 = vsub.f32 %v2766_v53, %v1306_v30  ;;  %2158 = vrcp.f32 %v1376_v21  ;;  %v1390_v48 = vmul.f32 %v2147_v33, %v2775_v62 }
 0x303   : > { %v1444_v7 = vadd.f32 %v1443_v40, %v1436_v50 }
 0x304   : > { %v1421_v56 = vsub.f32 %v1413_v45, %v1317_v49  ;;  %v2149_v43 = vpop.eup %2148  ;;  %v1430_v46 = vmul.f32 %v1422_v59, %v1390_v48 }
 0x305   : > { %v1406_v5 = vmul.f32 0.6931472, %v2149_v43 }
 0x306   : > { %v1429_v0 = vmul.f32 %v1421_v56, %v1389_v29  ;;  %v1438_v16 = vsel %vm1224_vm3, %v1430_v46, 0.0 }
 0x307   : > { %v2151_v61 = vpop.eup %2150  ;;  %v1415_v47 = vsub.f32 %v2773_v60, %v1406_v5 }
 0x308   : > { %v1310_v42 = vmul.f32 0.6931472, %v2151_v61  ;;  %v2153_v53 = vpop.eup %2152  ;;  %v1437_v3 = vsel %vm1224_vm3, %v1429_v0, 0.0 }
 0x309   : > { %v2155_v4 = vpop.eup %2154  ;;  %v1445_v10 = vadd.f32 %v1444_v7, %v1437_v3  ;;  %v1391_v62 = vmul.f32 %v2153_v53, %v2794_v11 }
 0x30a   : > { %v1319_v8 = vsub.f32 %v2779_v54, %v1310_v42  ;;  %v1408_v9 = vmul.f32 0.6931472, %v2155_v4 }
 0x30b   : > { %v2157_v22 = vpop.eup %2156  ;;  %v1446_v54 = vadd.f32 %v1445_v10, %v1438_v16 }
 0x30c   : > { %v1423_v14 = vsub.f32 %v1415_v47, %v1319_v8  ;;  %v1312_v15 = vmul.f32 0.6931472, %v2157_v22  ;;  %v2159_v38 = vpop.eup %2158  ;;  %v1416_v60 = vsub.f32 %v2784_v1, %v1408_v9  ;;  %v2201_v1 = vmov 0.0  }
 0x30d   : > { %v1392_v17 = vmul.f32 %v2159_v38, %v2797_v55  ;;  %573 = vst.msk [vmem:[%s567_s13] sm:$0x1] %vm572_vm4, %v2201_v1 }
 0x30e   : > { %v1320_v12 = vsub.f32 %v2790_v24, %v1312_v15  ;;  %v1431_v2 = vmul.f32 %v1423_v14, %v1391_v62 }
 0x310   : > { %v1424_v13 = vsub.f32 %v1416_v60, %v1320_v12  ;;  %v1439_v18 = vsel %vm1224_vm3, %v1431_v2, 0.0 }
 0x311   : > { %v1447_v37 = vadd.f32 %v1446_v54, %v1439_v18 }
 0x312   : > { %v1432_v27 = vmul.f32 %v1424_v13, %v1392_v17 }
 0x314   : > { %v1440_v11 = vsel %vm1224_vm3, %v1432_v27, 0.0  ;;  %v1441_v21 = vld [vmem:[%s567_s13] sm:$0x1] }
 0x315   : > { %v1448_v19 = vadd.f32 %v1447_v37, %v1440_v11 }
 0x317   : > { %1449 = vadd.xlane.f32.xlu0 %v1448_v19 }
 0x3a4   : > { %v1450_v24 = vpop.xlane.xlu0 %1449 }
 0x3a5   : > { %v1451_v55 = vrot.slane %v1450_v24, 4 }
 0x3a7   : > { %v1452_v34 = vadd.f32 %v1451_v55, %v1450_v24 }
 0x3a9   : > { %v1453_v39 = vrot.slane %v1452_v34, 2 }
 0x3ab   : > { %v1454_v57 = vadd.f32 %v1453_v39, %v1452_v34 }
 0x3ad   : > { %v1455_v32 = vrot.slane %v1454_v57, 1 }
 0x3af   : > { %v1456_v23 = vadd.f32 %v1455_v32, %v1454_v57 }
 0x3b1   : > { %2004 = vpush %v1456_v23 }
 0x3e2   : > { %s2005_s14 = spop %2004 }
 0x3e3   : > { %v1458_v63 = vstv %s2005_s14 }
 0x3e4   : > { %v1459_v25 = vadd.f32 %v1458_v63, %v1441_v21 }
 0x3e6   : > { %1461 = vst.msk [vmem:[%s567_s13] sm:$0x1] %vm572_vm4, %v1459_v25 }
 0x3ed   : > { %v1465_v20 = vld [vmem:[%s567_s13] sm:$0x1] }
 0x3ee   : > { %v1466_v6 = vmul.f32 0.0078125, %v1465_v20 }
 0x3f0   : > { %1467 = vst.msk [vmem:[%s567_s13] sm:$0x1] %vm572_vm4, %v1466_v6 }
 0x3f1 PF: > { %s14_s19 = sadd.s32 1, %s2198_s19   ;;  %s2871_s15 = smov %s2186_s16 }
 0x3f2   : > { %p11_p10 = scmp.ge.s32.totalorder %s14_s19, 4   ;;  %s2872_s16 = smov %s2266_s24 }
 0x3f3   : > { %s2873_s17 = smov %s2194_s18  ;;  %s2874_s18 = smov %s2876_s20 }
 0x3f4   :  { %13 = sbr.rel (!%p11_p10) target bundleno = 3 (0x3), region = 169 }

</bundles_post_ra>
